<compile_context>
chip_gen: v7x
topology: tpu7x:2x2x1
jax: 0.10.0
libtpu: 0.0.40
codegen_flags: <defaults>
</compile_context>

<pallas_src>
import jax
import jax.numpy as jnp
from jax import lax
from jax.experimental import pallas as pl
from jax.experimental.pallas import tpu as pltpu


def _stc_kernel(p_ref, wc_ref, bc_ref, w1_ref, b1_ref, w2_ref, b2_ref, o_ref):
    """Fused sampler-conv (im2col matmul) + SiLU + readout MLP (Linear-GELU-Linear).

    bf16 operands / f32 accumulation on the MXU; f32 element-wise epilogues;
    sigmoid / tanh transcendentals go to the EUP.
    """
    patches = p_ref[...]                                                # (tm, K) bf16

    # --- Conv3d(kernel=stride=downsample, padding=1) as patches @ Wc + bc ---
    h = jnp.dot(patches, wc_ref[...], preferred_element_type=jnp.float32)
    h = h + bc_ref[...].astype(jnp.float32)
    # --- SiLU ---
    h = h * jax.nn.sigmoid(h)

    # --- readout Linear 1 ---
    h = jnp.dot(h.astype(jnp.bfloat16), w1_ref[...],
                preferred_element_type=jnp.float32)
    h = h + b1_ref[...].astype(jnp.float32)
    # --- GELU (tanh approximation -> EUP slot instead of VPU erf polynomial) ---
    h = jax.nn.gelu(h, approximate=True)

    # --- readout Linear 2 ---
    y = jnp.dot(h.astype(jnp.bfloat16), w2_ref[...],
                preferred_element_type=jnp.float32)
    y = y + b2_ref[...].astype(jnp.float32)

    o_ref[...] = y.astype(o_ref.dtype)


def _im2col_3d(x, downsample):
    """Patch extraction of Conv3d(kernel=stride=downsample, padding=1).

    x: (B, T, H, W, D) -> patches (B*To*Ho*Wo, dt*dh*dw*D), plus (To, Ho, Wo).
    Patch flattening order is (kt, kh, kw, c_in).
    """
    B, T, H, W, D = x.shape
    dt, dh, dw = downsample
    xp = jnp.pad(x, ((0, 0), (1, 1), (1, 1), (1, 1), (0, 0)))
    To = (T + 2 - dt) // dt + 1
    Ho = (H + 2 - dh) // dh + 1
    Wo = (W + 2 - dw) // dw + 1
    xp = xp[:, :To * dt, :Ho * dh, :Wo * dw, :]
    xp = xp.reshape(B, To, dt, Ho, dh, Wo, dw, D)
    xp = xp.transpose(0, 1, 3, 5, 2, 4, 6, 7)          # (B, To, Ho, Wo, dt, dh, dw, D)
    patches = xp.reshape(B * To * Ho * Wo, dt * dh * dw * D)
    return patches, (To, Ho, Wo)


def stc_connector_forward(x, params, *, downsample=(2, 2, 2), tm=256,
                          h=24, w=24, out_dtype=None):
    """STCConnector forward (depth=0: s1 = s2 = Identity).

    x: (B, T, H, W, D) or (B, T, L, D) with L = h*w.
    Returns (B, To*Ho*Wo, Do).

    tm: token tile. Default 256 fills the 256-wide MXU on v6e/v7x; 128 is enough
    on v5e. Token count is padded to a multiple of tm, so any B*T*H*W works.
    """
    if x.ndim == 4:
        B, T, L, D = x.shape
        x = x.reshape(B, T, h, w, D)
    B, T, H, W, D = x.shape
    out_dtype = out_dtype or x.dtype

    patches, (To, Ho, Wo) = _im2col_3d(x, downsample)
    n_tok, K = patches.shape
    # bf16 operands: native MXU rate + half the per-token HBM traffic.
    patches = patches.astype(jnp.bfloat16)

    wc = params["wc"].astype(jnp.bfloat16)              # (K, Dh)
    w1 = params["w1"].astype(jnp.bfloat16)              # (Dh, Do)
    w2 = params["w2"].astype(jnp.bfloat16)              # (Do, Do)
    Dh = wc.shape[1]
    Do = w2.shape[1]
    bc = params["bc"].reshape(1, Dh).astype(jnp.float32)
    b1 = params["b1"].reshape(1, Do).astype(jnp.float32)
    b2 = params["b2"].reshape(1, Do).astype(jnp.float32)

    # Pad token count to a multiple of the token tile (padded rows are garbage
    # and sliced off below).
    n_pad = pl.cdiv(n_tok, tm) * tm
    if n_pad != n_tok:
        patches = jnp.pad(patches, ((0, n_pad - n_tok), (0, 0)))
    grid = (n_pad // tm,)

    # Grid-invariant weights: constant index maps keep them VMEM-resident across
    # the token grid. At these sizes (< 1 MiB total, bf16) the default double
    # buffer is negligible; for very large channel dims, tile the output-channel
    # axis with an extra grid dimension + accumulator scratch instead.
    def bcast(shape):
        return pl.BlockSpec(shape, lambda i: (0,) * len(shape))

    # Explicit VMEM budget: double-buffered tiles + resident weights + headroom.
    out_itemsize = jnp.dtype(out_dtype).itemsize
    weight_bytes = (wc.size + w1.size + w2.size) * 2 \
        + (bc.size + b1.size + b2.size) * 4
    tile_bytes = tm * K * 2 + tm * Do * out_itemsize
    vmem_limit = 2 * tile_bytes + 2 * weight_bytes + (8 << 20)
    vmem_limit = int(min(max(vmem_limit, 16 << 20), 48 << 20))  # stay < v7x 64 MiB

    out = pl.pallas_call(
        _stc_kernel,
        out_shape=jax.ShapeDtypeStruct((n_pad, Do), out_dtype),
        grid_spec=pltpu.PrefetchScalarGridSpec(
            num_scalar_prefetch=0,
            grid=grid,
            in_specs=[
                pl.BlockSpec((tm, K), lambda i: (i, 0)),   # patch tokens
                bcast((K, Dh)),                            # conv weight
                bcast((1, Dh)),                            # conv bias
                bcast((Dh, Do)),                           # readout W1
                bcast((1, Do)),                            # readout b1
                bcast((Do, Do)),                           # readout W2
                bcast((1, Do)),                            # readout b2
            ],
            out_specs=pl.BlockSpec((tm, Do), lambda i: (i, 0)),
        ),
        compiler_params=pltpu.CompilerParams(
            dimension_semantics=("parallel",),   # shards token tiles across v7x's 2 TCs
            vmem_limit_bytes=vmem_limit,
        ),
    )(patches, wc, bc, w1, b1, w2, b2)

    out = out[:n_tok]
    return out.reshape(B, To * Ho * Wo, Do)


def _reference(x, params, downsample=(2, 2, 2)):
    """Pure-JAX f32 reference (independent lax.conv path, exact erf GELU)."""
    B, T, H, W, D = x.shape
    dt, dh, dw = downsample
    xc = jnp.transpose(x, (0, 4, 1, 2, 3)).astype(jnp.float32)       # b d t h w
    Dh = params["wc"].shape[1]
    wc = params["wc"].reshape(dt, dh, dw, D, Dh).astype(jnp.float32)
    w_oidhw = jnp.transpose(wc, (4, 3, 0, 1, 2))                     # (O, I, kt, kh, kw)
    y = lax.conv_general_dilated(
        xc, w_oidhw, window_strides=downsample,
        padding=[(1, 1), (1, 1), (1, 1)],
        dimension_numbers=("NCDHW", "OIDHW", "NCDHW"))
    y = y + params["bc"].reshape(1, Dh, 1, 1, 1).astype(jnp.float32)
    y = y * jax.nn.sigmoid(y)                                        # SiLU
    Bo, _, To, Ho, Wo = y.shape
    y = jnp.transpose(y, (0, 2, 3, 4, 1)).reshape(Bo, To * Ho * Wo, Dh)
    h1 = y @ params["w1"].astype(jnp.float32) + params["b1"].astype(jnp.float32)
    h1 = 0.5 * h1 * (1.0 + lax.erf(h1 / jnp.sqrt(2.0)))              # exact GELU
    out = h1 @ params["w2"].astype(jnp.float32) + params["b2"].astype(jnp.float32)
    return out


def init_params(key, in_channels, hidden, out_hidden, downsample=(2, 2, 2),
                dtype=jnp.float32):
    dt, dh, dw = downsample
    K = dt * dh * dw * in_channels
    ks = jax.random.split(key, 6)

    def uni(k, shape, fan_in):
        lim = 1.0 / jnp.sqrt(jnp.float32(fan_in))
        return ((jax.random.uniform(k, shape, jnp.float32) * 2 - 1) * lim).astype(dtype)

    return {
        # Conv3d weight stored as (kt*kh*kw*Cin, Cout) to match im2col patch
        # flattening (== torch weight (O, I, kt, kh, kw) permuted & reshaped).
        "wc": uni(ks[0], (K, hidden), K),
        "bc": uni(ks[1], (hidden,), K),
        "w1": uni(ks[2], (hidden, out_hidden), hidden),
        "b1": uni(ks[3], (out_hidden,), hidden),
        "w2": uni(ks[4], (out_hidden, out_hidden), out_hidden),
        "b2": uni(ks[5], (out_hidden,), out_hidden),
    }


if __name__ == "__main__":
    key = jax.random.PRNGKey(0)
    kx, kp = jax.random.split(key)

    # Small video-token input consistent with STCConnector:
    # B=2 clips, T=4 frames, 8x8 spatial tokens, mm_hidden_size == hidden_size == 128.
    B, T, H, W, D = 2, 4, 8, 8, 128
    x = jax.random.normal(kx, (B, T, H, W, D), jnp.float32)
    params = init_params(kp, D, D, D)

    out = stc_connector_forward(x, params, tm=256)
    out = jax.block_until_ready(out)

    ref = _reference(x, params)
    To, Ho, Wo = T // 2 + 1, H // 2 + 1, W // 2 + 1
    assert out.shape == ref.shape == (B, To * Ho * Wo, D)

    # bf16 matmul operands + tanh-GELU approximation => loosened tolerance vs the
    # f32 / erf-GELU reference.
    err = jnp.max(jnp.abs(out.astype(jnp.float32) - ref))
    scale = jnp.max(jnp.abs(ref)) + 1e-6
    assert err / scale < 5e-2, f"kernel mismatch: max abs err {err}, rel {err / scale}"

    print("KERNEL_OK")
</pallas_src>

<mosaic_0001>
module attributes {stable_mosaic.version = 11 : i64} {
  func.func @_stc_kernel(%arg0: i32, %arg1: memref<256x1024xbf16, #tpu.memory_space<vmem>>, %arg2: memref<1024x128xbf16, #tpu.memory_space<vmem>>, %arg3: memref<1x128xf32, #tpu.memory_space<vmem>>, %arg4: memref<128x128xbf16, #tpu.memory_space<vmem>>, %arg5: memref<1x128xf32, #tpu.memory_space<vmem>>, %arg6: memref<128x128xbf16, #tpu.memory_space<vmem>>, %arg7: memref<1x128xf32, #tpu.memory_space<vmem>>, %arg8: memref<256x128xf32, #tpu.memory_space<vmem>>) attributes {dimension_semantics = [#tpu.dimension_semantics<parallel>], iteration_bounds = array<i64: 1>, scalar_prefetch = 0 : i64, scratch_operands = 0 : i64, tpu.core_type = #tpu.core_type<tc>, window_params = [{transform_indices = @transform_0, window_bounds = array<i64: 256, 1024>}, {pipeline_mode = #tpu.pipeline_mode<synchronous>, transform_indices = @transform_1, window_bounds = array<i64: 1024, 128>}, {pipeline_mode = #tpu.pipeline_mode<synchronous>, transform_indices = @transform_2, window_bounds = array<i64: 1, 128>}, {pipeline_mode = #tpu.pipeline_mode<synchronous>, transform_indices = @transform_3, window_bounds = array<i64: 128, 128>}, {pipeline_mode = #tpu.pipeline_mode<synchronous>, transform_indices = @transform_4, window_bounds = array<i64: 1, 128>}, {pipeline_mode = #tpu.pipeline_mode<synchronous>, transform_indices = @transform_5, window_bounds = array<i64: 128, 128>}, {pipeline_mode = #tpu.pipeline_mode<synchronous>, transform_indices = @transform_6, window_bounds = array<i64: 1, 128>}, {transform_indices = @transform_7, window_bounds = array<i64: 256, 128>}]} {
    %c0 = arith.constant 0 : index
    %c0_0 = arith.constant 0 : index
    %0 = vector.load %arg1[%c0, %c0_0] : memref<256x1024xbf16, #tpu.memory_space<vmem>>, vector<256x1024xbf16>
    %c0_1 = arith.constant 0 : index
    %c0_2 = arith.constant 0 : index
    %1 = vector.load %arg2[%c0_1, %c0_2] : memref<1024x128xbf16, #tpu.memory_space<vmem>>, vector<1024x128xbf16>
    %cst = arith.constant dense<0.000000e+00> : vector<256x128xf32>
    %2 = tpu.matmul %0, %1, %cst {dimension_numbers = #tpu.dot_dimension_numbers<[1], [0], [0], [1], [0, 0, 1, 1], [], []>} : vector<256x1024xbf16>, vector<1024x128xbf16>, vector<256x128xf32> -> vector<256x128xf32>
    %c0_3 = arith.constant 0 : index
    %c0_4 = arith.constant 0 : index
    %3 = vector.load %arg3[%c0_3, %c0_4] : memref<1x128xf32, #tpu.memory_space<vmem>>, vector<1x128xf32>
    %4 = vector.broadcast %3 : vector<1x128xf32> to vector<256x128xf32>
    %5 = arith.addf %2, %4 : vector<256x128xf32>
    %6 = arith.negf %5 : vector<256x128xf32>
    %7 = math.exp %6 : vector<256x128xf32>
    %cst_5 = arith.constant 1.000000e+00 : f32
    %8 = vector.broadcast %cst_5 : f32 to vector<256x128xf32>
    %9 = arith.addf %8, %7 : vector<256x128xf32>
    %10 = arith.divf %8, %9 : vector<256x128xf32>
    %11 = arith.mulf %5, %10 : vector<256x128xf32>
    %12 = arith.truncf %11 : vector<256x128xf32> to vector<256x128xbf16>
    %c0_6 = arith.constant 0 : index
    %c0_7 = arith.constant 0 : index
    %13 = vector.load %arg4[%c0_6, %c0_7] : memref<128x128xbf16, #tpu.memory_space<vmem>>, vector<128x128xbf16>
    %cst_8 = arith.constant dense<0.000000e+00> : vector<256x128xf32>
    %14 = tpu.matmul %12, %13, %cst_8 {dimension_numbers = #tpu.dot_dimension_numbers<[1], [0], [0], [1], [0, 0, 1, 1], [], []>} : vector<256x128xbf16>, vector<128x128xbf16>, vector<256x128xf32> -> vector<256x128xf32>
    %c0_9 = arith.constant 0 : index
    %c0_10 = arith.constant 0 : index
    %15 = vector.load %arg5[%c0_9, %c0_10] : memref<1x128xf32, #tpu.memory_space<vmem>>, vector<1x128xf32>
    %16 = vector.broadcast %15 : vector<1x128xf32> to vector<256x128xf32>
    %17 = arith.addf %14, %16 : vector<256x128xf32>
    %18 = arith.mulf %17, %17 : vector<256x128xf32>
    %19 = arith.mulf %17, %18 : vector<256x128xf32>
    %cst_11 = arith.constant 4.471500e-02 : f32
    %20 = vector.broadcast %cst_11 : f32 to vector<256x128xf32>
    %21 = arith.mulf %20, %19 : vector<256x128xf32>
    %22 = arith.addf %17, %21 : vector<256x128xf32>
    %cst_12 = arith.constant 0.797884583 : f32
    %23 = vector.broadcast %cst_12 : f32 to vector<256x128xf32>
    %24 = arith.mulf %23, %22 : vector<256x128xf32>
    %25 = math.tanh %24 : vector<256x128xf32>
    %cst_13 = arith.constant 1.000000e+00 : f32
    %26 = vector.broadcast %cst_13 : f32 to vector<256x128xf32>
    %27 = arith.addf %26, %25 : vector<256x128xf32>
    %cst_14 = arith.constant 5.000000e-01 : f32
    %28 = vector.broadcast %cst_14 : f32 to vector<256x128xf32>
    %29 = arith.mulf %28, %27 : vector<256x128xf32>
    %30 = arith.mulf %17, %29 : vector<256x128xf32>
    %31 = arith.truncf %30 : vector<256x128xf32> to vector<256x128xbf16>
    %c0_15 = arith.constant 0 : index
    %c0_16 = arith.constant 0 : index
    %32 = vector.load %arg6[%c0_15, %c0_16] : memref<128x128xbf16, #tpu.memory_space<vmem>>, vector<128x128xbf16>
    %cst_17 = arith.constant dense<0.000000e+00> : vector<256x128xf32>
    %33 = tpu.matmul %31, %32, %cst_17 {dimension_numbers = #tpu.dot_dimension_numbers<[1], [0], [0], [1], [0, 0, 1, 1], [], []>} : vector<256x128xbf16>, vector<128x128xbf16>, vector<256x128xf32> -> vector<256x128xf32>
    %c0_18 = arith.constant 0 : index
    %c0_19 = arith.constant 0 : index
    %34 = vector.load %arg7[%c0_18, %c0_19] : memref<1x128xf32, #tpu.memory_space<vmem>>, vector<1x128xf32>
    %35 = vector.broadcast %34 : vector<1x128xf32> to vector<256x128xf32>
    %36 = arith.addf %33, %35 : vector<256x128xf32>
    %c0_20 = arith.constant 0 : index
    %c0_21 = arith.constant 0 : index
    %37 = vector.load %arg8[%c0_20, %c0_21] : memref<256x128xf32, #tpu.memory_space<vmem>>, vector<256x128xf32>
    tpu.vector_store %arg8[%c0_20, %c0_21], %36 {strides = array<i32>} : memref<256x128xf32, #tpu.memory_space<vmem>>, vector<256x128xf32>,
    return
  }
  func.func @transform_0(%arg0: i32) -> (i32, i32) {
    %c0_i32 = arith.constant 0 : i32
    %c0_i32_0 = arith.constant 0 : i32
    return %arg0, %c0_i32 : i32, i32
  }
  func.func @transform_1(%arg0: i32) -> (i32, i32) {
    %c0_i32 = arith.constant 0 : i32
    %c0_i32_0 = arith.constant 0 : i32
    %c0_i32_1 = arith.constant 0 : i32
    return %c0_i32, %c0_i32_0 : i32, i32
  }
  func.func @transform_2(%arg0: i32) -> (i32, i32) {
    %c0_i32 = arith.constant 0 : i32
    %c0_i32_0 = arith.constant 0 : i32
    %c0_i32_1 = arith.constant 0 : i32
    return %c0_i32, %c0_i32_0 : i32, i32
  }
  func.func @transform_3(%arg0: i32) -> (i32, i32) {
    %c0_i32 = arith.constant 0 : i32
    %c0_i32_0 = arith.constant 0 : i32
    %c0_i32_1 = arith.constant 0 : i32
    return %c0_i32, %c0_i32_0 : i32, i32
  }
  func.func @transform_4(%arg0: i32) -> (i32, i32) {
    %c0_i32 = arith.constant 0 : i32
    %c0_i32_0 = arith.constant 0 : i32
    %c0_i32_1 = arith.constant 0 : i32
    return %c0_i32, %c0_i32_0 : i32, i32
  }
  func.func @transform_5(%arg0: i32) -> (i32, i32) {
    %c0_i32 = arith.constant 0 : i32
    %c0_i32_0 = arith.constant 0 : i32
    %c0_i32_1 = arith.constant 0 : i32
    return %c0_i32, %c0_i32_0 : i32, i32
  }
  func.func @transform_6(%arg0: i32) -> (i32, i32) {
    %c0_i32 = arith.constant 0 : i32
    %c0_i32_0 = arith.constant 0 : i32
    %c0_i32_1 = arith.constant 0 : i32
    return %c0_i32, %c0_i32_0 : i32, i32
  }
  func.func @transform_7(%arg0: i32) -> (i32, i32) {
    %c0_i32 = arith.constant 0 : i32
    %c0_i32_0 = arith.constant 0 : i32
    return %arg0, %c0_i32 : i32, i32
  }
}

</mosaic_0001>

<bundles_post_ra>
// kernel: tpu_custom_call.1
= control target key start
LH: loop header
LB: loop body
LE: loop exit
PB: predicated region body
PF: predicated region fallthrough
CT: control target
= control target key end

     0   :  { %12 = vsyncpa [#allocation3], 0  ;;  %s4973_s0 = inlined_call_operand.hbm [shape: bf16[256,1024], index: 0, kind: input, shape index: {}]   ;;  %s4974_s1 = inlined_call_operand.hbm [shape: bf16[1024,128], index: 1, kind: input, shape index: {}]   ;;  %s4975_s2 = inlined_call_operand.vmem [shape: f32[1,128], index: 2, kind: input, shape index: {}]   ;;  %s4976_s3 = inlined_call_operand.hbm [shape: bf16[128,128], index: 3, kind: input, shape index: {}]   ;;  %s4977_s4 = inlined_call_operand.vmem [shape: f32[1,128], index: 4, kind: input, shape index: {}]   ;;  %s4978_s5 = inlined_call_operand.hbm [shape: bf16[128,128], index: 5, kind: input, shape index: {}]   ;;  %s4979_s6 = inlined_call_operand.vmem [shape: f32[1,128], index: 6, kind: input, shape index: {}]   ;;  %s4980_s7 = inlined_call_operand.hbm [shape: f32[256,128], index: 7, kind: output, shape index: {}]  }
   0x1   :  { %13 = vsyncpa [#allocation6], 0 }
   0x2   :  { %14 = vsyncpa [#allocation9], 0 }
   0x3   :  { %15 = vsyncpa [#allocation4], 0  ;;  %s4309_s24 = smov [#allocation5]   ;;  %s4191_s28 = scalar_lea.hbm %s4974_s1, 8192 }
   0x4   :  { %s33_s25 = sshll.u32 %s4309_s24, 4  ;;  %p4192_p0 = scmp.ne.s32.totalorder %s4974_s1, %s4191_s28  ;;  %s34_s25 = int_to_ptr.vmem [resolvable:$true] %s33_s25 }
   0x5   :  { %p4195_p1 = scmp.lt.u32.totalorder %s4191_s28, %s4974_s1 }
   0x7   :  { %p4197_p2 = pnand %p4195_p1, %p4192_p0 }
   0x9   :  { %4200 = shalt.err (!%p4197_p2)
}
   0xa   :  { %s4201_s10 = scalar_lea.vmem %s34_s25, 8192  ;;  %p4206_p4 = scmp.lt.s32.totalorder %s34_s25, %s34_s25 }
   0xb   :  { %p4202_p3 = scmp.ne.s32.totalorder %s34_s25, %s4201_s10  ;;  %p4207_p5 = scmp.lt.s32.totalorder %s4201_s10, %s4201_s10 }
   0xd   :  { %p4208_p6 = por %p4207_p5, %p4206_p4 }
   0xf   :  { %p4209_p7 = pnand %p4208_p6, %p4202_p3 }
  0x11   :  { %4212 = shalt.err (!%p4209_p7)
}
  0x12   :  { %s4310_s11 = smov 64   ;;  %s4311_s12 = smov 4  }
  0x13   :  { %39 = dma.hbm_to_vmem [thread:$0]  %s4974_s1, 8192, %s34_s25, [#allocation6], %s4310_s11, %s4310_s11, %s4311_s12  }
  0x14   :  { %s4312_s15 = smov [#allocation2]   ;;  %s4213_s19 = scalar_lea.hbm %s4973_s0, 16384 }
  0x15   :  { %s21_s16 = sshll.u32 %s4312_s15, 4  ;;  %p4214_p8 = scmp.ne.s32.totalorder %s4973_s0, %s4213_s19  ;;  %s22_s16 = int_to_ptr.vmem [resolvable:$true] %s21_s16 }
  0x16   :  { %p4217_p9 = scmp.lt.u32.totalorder %s4213_s19, %s4973_s0 }
  0x18   :  { %p4219_p10 = pnand %p4217_p9, %p4214_p8 }
  0x1a   :  { %4222 = shalt.err (!%p4219_p10)
}
  0x1b   :  { %s4223_s24 = scalar_lea.vmem %s22_s16, 16384  ;;  %p4228_p12 = scmp.lt.s32.totalorder %s22_s16, %s22_s16 }
  0x1c   :  { %p4224_p11 = scmp.ne.s32.totalorder %s22_s16, %s4223_s24  ;;  %p4229_p13 = scmp.lt.s32.totalorder %s4223_s24, %s4223_s24 }
  0x1e   :  { %p4230_p0 = por %p4229_p13, %p4228_p12 }
  0x20   :  { %p4231_p1 = pnand %p4230_p0, %p4224_p11 }
  0x22   :  { %4234 = shalt.err (!%p4231_p1)
}
  0x23   :  { %s4313_s1 = smov 512   ;;  %s4314_s25 = smov 32  }
  0x24   :  { %27 = dma.hbm_to_vmem [thread:$0]  %s4973_s0, 16384, %s22_s16, [#allocation3], %s4313_s1, %s4313_s1, %s4314_s25  }
  0x25   :  { %s4315_s28 = smov [#allocation7]   ;;  %s4316_s30 = smov [#allocation8]  }
  0x26   :  { %s47_s29 = sshll.u32 %s4315_s28, 4  ;;  %s61_s8 = sshll.u32 %s4316_s30, 4  ;;  %s48_s29 = int_to_ptr.vmem [resolvable:$true] %s47_s29  ;;  %s4387_s8 = int_to_ptr.vmem [resolvable:$true] %s61_s8 }
  0x27   :  { %s4235_s13 = scalar_lea.hbm %s4976_s3, 1024 }
  0x28   :  { %p4236_p2 = scmp.ne.s32.totalorder %s4976_s3, %s4235_s13  ;;  %p4239_p3 = scmp.lt.u32.totalorder %s4235_s13, %s4976_s3 }
  0x2a   :  { %p4241_p4 = pnand %p4239_p3, %p4236_p2 }
  0x2c   :  { %4244 = shalt.err (!%p4241_p4)
}
  0x2d   :  { %s4245_s0 = scalar_lea.vmem %s48_s29, 1024  ;;  %p4250_p6 = scmp.lt.s32.totalorder %s48_s29, %s48_s29 }
  0x2e   :  { %p4246_p5 = scmp.ne.s32.totalorder %s48_s29, %s4245_s0  ;;  %p4251_p7 = scmp.lt.s32.totalorder %s4245_s0, %s4245_s0 }
  0x30   :  { %p4252_p8 = por %p4251_p7, %p4250_p6 }
  0x32   :  { %p4253_p9 = pnand %p4252_p8, %p4246_p5 }
  0x34   :  { %4256 = shalt.err (!%p4253_p9)
}
  0x35   :  { %53 = dma.hbm_to_vmem [thread:$0]  %s4976_s3, 1024, %s48_s29, [#allocation6], %s4310_s11, %s4310_s11, %s4311_s12  }
  0x36   :  { %s4257_s22 = scalar_lea.hbm %s4978_s5, 1024 }
  0x37   :  { %p4258_p10 = scmp.ne.s32.totalorder %s4978_s5, %s4257_s22  ;;  %p4261_p11 = scmp.lt.u32.totalorder %s4257_s22, %s4978_s5 }
  0x39   :  { %p4263_p12 = pnand %p4261_p11, %p4258_p10 }
  0x3b   :  { %4266 = shalt.err (!%p4263_p12)
}
  0x3c   :  { %s4267_s26 = scalar_lea.vmem %s4387_s8, 1024  ;;  %p4272_p0 = scmp.lt.s32.totalorder %s4387_s8, %s4387_s8 }
  0x3d   :  { %p4268_p13 = scmp.ne.s32.totalorder %s4387_s8, %s4267_s26  ;;  %p4273_p1 = scmp.lt.s32.totalorder %s4267_s26, %s4267_s26 }
  0x3f   :  { %p4274_p2 = por %p4273_p1, %p4272_p0 }
  0x41   :  { %p4275_p3 = pnand %p4274_p2, %p4268_p13 }
  0x43   :  { %4278 = shalt.err (!%p4275_p3)
}
  0x44   :  { %67 = dma.hbm_to_vmem [thread:$0]  %s4978_s5, 1024, %s4387_s8, [#allocation9], %s4310_s11, %s4310_s11, %s4311_s12  }
  0x45   :  { %4301 = dma.done.wait [#allocation3], 16384  }
  0x46   :  { %4302 = vsyncadd [#allocation3], 4294950912 }
  0x47   :  { %4303 = dma.done.wait [#allocation6], 9216  }
  0x48   :  { %4304 = vsyncadd [#allocation6], 4294958080 }
  0x49   :  { %4305 = dma.done.wait [#allocation9], 1024  }
  0x4a   :  { %4306 = vsyncadd [#allocation9], 4294966272  ;;  %v3919_v0 = vld [vmem:[#allocation5 + $0x40] sm:$0xff]   ;;  %v3923_v4 = vld [vmem:[#allocation5 + $0x48] sm:$0xff]  }
  0x4b   :  { %v3920_v1 = vld [vmem:[#allocation5 + $0xc0] sm:$0xff]   ;;  %3316 = vmatprep.subr.bf16.mxu0 %v3919_v0  ;;  %v3924_v5 = vld [vmem:[#allocation5 + $0xc8] sm:$0xff]   ;;  %v3927_v8 = vld [vmem:[#allocation5 + $0x50] sm:$0xff]  }
  0x4c   :  { %v3921_v2 = vld [vmem:[#allocation5] sm:$0xff]   ;;  %3428 = vmatprep.subr.bf16.mxu1 %v3920_v1  ;;  %v3925_v6 = vld [vmem:[#allocation5 + $0x8] sm:$0xff]   ;;  %v3928_v9 = vld [vmem:[#allocation5 + $0xd0] sm:$0xff]  }
  0x4d   :  { %v3922_v3 = vld [vmem:[#allocation5 + $0x80] sm:$0xff]   ;;  %3317 = vmatpush3.bf16.msra.mxu0 %v3921_v2  ;;  %v3926_v7 = vld [vmem:[#allocation5 + $0x88] sm:$0xff]   ;;  %v3929_v10 = vld [vmem:[#allocation5 + $0x10] sm:$0xff]  }
  0x4e   :  { %3429 = vmatpush3.bf16.msra.mxu1 %v3922_v3  ;;  %3318 = vmatprep.subr.bf16.mxu0 %v3923_v4  ;;  %v3930_v11 = vld [vmem:[#allocation5 + $0x90] sm:$0xff]   ;;  %v3931_v12 = vld [vmem:[#allocation5 + $0x58] sm:$0xff]   ;;  %v3935_v16 = vld [vmem:[#allocation5 + $0x60] sm:$0xff]  }
  0x4f   :  { %3430 = vmatprep.subr.bf16.mxu1 %v3924_v5  ;;  %v3932_v13 = vld [vmem:[#allocation5 + $0xd8] sm:$0xff]   ;;  %v3936_v17 = vld [vmem:[#allocation5 + $0xe0] sm:$0xff]   ;;  %v3939_v20 = vld [vmem:[#allocation5 + $0x68] sm:$0xff]  }
  0x50   :  { %v3933_v14 = vld [vmem:[#allocation5 + $0x18] sm:$0xff]   ;;  %v3937_v18 = vld [vmem:[#allocation5 + $0x20] sm:$0xff]   ;;  %v3940_v21 = vld [vmem:[#allocation5 + $0xe8] sm:$0xff]  }
  0x51   :  { %3319 = vmatpush3.bf16.msra.mxu0 %v3925_v6  ;;  %v3934_v15 = vld [vmem:[#allocation5 + $0x98] sm:$0xff]   ;;  %v3938_v19 = vld [vmem:[#allocation5 + $0xa0] sm:$0xff]   ;;  %v3941_v22 = vld [vmem:[#allocation5 + $0x28] sm:$0xff]  }
  0x52   :  { %3431 = vmatpush3.bf16.msra.mxu1 %v3926_v7  ;;  %3320 = vmatprep.subr.bf16.mxu0 %v3927_v8  ;;  %v3942_v23 = vld [vmem:[#allocation5 + $0xa8] sm:$0xff]   ;;  %v3943_v24 = vld [vmem:[#allocation5 + $0x70] sm:$0xff]   ;;  %v3947_v28 = vld [vmem:[#allocation5 + $0x78] sm:$0xff]  }
  0x53   :  { %3432 = vmatprep.subr.bf16.mxu1 %v3928_v9  ;;  %v3944_v25 = vld [vmem:[#allocation5 + $0xf0] sm:$0xff]   ;;  %v3948_v29 = vld [vmem:[#allocation5 + $0xf8] sm:$0xff]   ;;  %v83_v32 = vld [vmem:[#allocation2] sm:$0xff] }
  0x54   :  { %v3945_v26 = vld [vmem:[#allocation5 + $0x30] sm:$0xff]   ;;  %v3949_v30 = vld [vmem:[#allocation5 + $0x38] sm:$0xff]   ;;  %v87_v33 = vld [vmem:[#allocation2 + $0x20] sm:$0xff] }
  0x55   :  { %3321 = vmatpush3.bf16.msra.mxu0 %v3929_v10  ;;  %v3946_v27 = vld [vmem:[#allocation5 + $0xb0] sm:$0xff]   ;;  %v3950_v31 = vld [vmem:[#allocation5 + $0xb8] sm:$0xff]   ;;  %v84_v34 = vld [vmem:[#allocation2 + $0x8] sm:$0xff]  ;;  %v3074_v35 = vcombine.low %v83_v32, %v87_v33  ;;  %v3075_v36 = vcombine.high %v83_v32, %v87_v33 }
  0x56   :  { %3433 = vmatpush3.bf16.msra.mxu1 %v3930_v11  ;;  %3322 = vmatprep.subr.bf16.mxu0 %v3931_v12  ;;  %v88_v37 = vld [vmem:[#allocation2 + $0x28] sm:$0xff]  ;;  %v3951_v40 = vld [vmem:[#allocation5 + $0x140] sm:$0xff]   ;;  %v3959_v2 = vld [vmem:[#allocation5 + $0x150] sm:$0xff]  }
  0x57   :  { %3434 = vmatprep.subr.bf16.mxu1 %v3932_v13  ;;  %v3076_v38 = vcombine.low %v84_v34, %v88_v37  ;;  %v3077_v39 = vcombine.high %v84_v34, %v88_v37  ;;  %1402 = vmatprep.mubr.bf16.mxu0 %v3075_v36  ;;  %v3952_v41 = vld [vmem:[#allocation5 + $0x100] sm:$0xff]   ;;  %v92_v47 = vld [vmem:[#allocation2 + $0x48] sm:$0xff]  ;;  %v3960_v4 = vld [vmem:[#allocation5 + $0x110] sm:$0xff]  }
  0x58   :  { %v3953_v42 = vld [vmem:[#allocation5 + $0x1c0] sm:$0xff]   ;;  %v96_v48 = vld [vmem:[#allocation2 + $0x68] sm:$0xff]  ;;  %v3961_v7 = vld [vmem:[#allocation5 + $0x1d0] sm:$0xff]  }
  0x59   :  { %3323 = vmatpush3.bf16.msra.mxu0 %v3933_v14  ;;  %1563 = vmatprep.mubr.bf16.mxu1 %v3077_v39  ;;  %v3954_v43 = vld [vmem:[#allocation5 + $0x180] sm:$0xff]   ;;  %v3085_v50 = vcombine.high %v92_v47, %v96_v48  ;;  %v100_v52 = vld [vmem:[#allocation2 + $0x88] sm:$0xff]  ;;  %v3084_v56 = vcombine.low %v92_v47, %v96_v48  ;;  %v3962_v9 = vld [vmem:[#allocation5 + $0x190] sm:$0xff]  }
  0x5a   :  { %3435 = vmatpush3.bf16.msra.mxu1 %v3934_v15  ;;  %3324 = vmatprep.subr.bf16.mxu0 %v3935_v16  ;;  %v91_v44 = vld [vmem:[#allocation2 + $0x40] sm:$0xff]  ;;  %v104_v53 = vld [vmem:[#allocation2 + $0xa8] sm:$0xff]  ;;  %v3963_v14 = vld [vmem:[#allocation5 + $0x158] sm:$0xff]  }
  0x5b   :  { %3436 = vmatprep.subr.bf16.mxu1 %v3936_v17  ;;  %v95_v45 = vld [vmem:[#allocation2 + $0x60] sm:$0xff]  ;;  %v3955_v55 = vld [vmem:[#allocation5 + $0x148] sm:$0xff]   ;;  %v3093_v59 = vcombine.high %v100_v52, %v104_v53  ;;  %v3092_v5 = vcombine.low %v100_v52, %v104_v53  ;;  %v3964_v15 = vld [vmem:[#allocation5 + $0x118] sm:$0xff]  }
  0x5c   :  { %v3083_v46 = vcombine.high %v91_v44, %v95_v45  ;;  %v99_v49 = vld [vmem:[#allocation2 + $0x80] sm:$0xff]  ;;  %v3082_v54 = vcombine.low %v91_v44, %v95_v45  ;;  %v3956_v58 = vld [vmem:[#allocation5 + $0x108] sm:$0xff]   ;;  %v3965_v17 = vld [vmem:[#allocation5 + $0x1d8] sm:$0xff]  }
  0x5d   :  { %3325 = vmatpush3.bf16.msra.mxu0 %v3937_v18  ;;  %v103_v51 = vld [vmem:[#allocation2 + $0xa0] sm:$0xff]  ;;  %v3957_v60 = vld [vmem:[#allocation5 + $0x1c8] sm:$0xff]   ;;  %v3976_v47 = vld [vmem:[#allocation5 + $0x130] sm:$0xff]  }
  0x5e   :  { %3437 = vmatpush3.bf16.msra.mxu1 %v3938_v19  ;;  %3326 = vmatprep.subr.bf16.mxu0 %v3939_v20  ;;  %v3091_v57 = vcombine.high %v99_v49, %v103_v51  ;;  %v3958_v61 = vld [vmem:[#allocation5 + $0x188] sm:$0xff]   ;;  %v107_v62 = vld [vmem:[#allocation2 + $0xc0] sm:$0xff]  ;;  %v3090_v3 = vcombine.low %v99_v49, %v103_v51  ;;  %v3966_v20 = vld [vmem:[#allocation5 + $0x198] sm:$0xff]  }
  0x5f   :  { %3438 = vmatprep.subr.bf16.mxu1 %v3940_v21  ;;  %v111_v63 = vld [vmem:[#allocation2 + $0xe0] sm:$0xff]  ;;  %v108_v0 = vld [vmem:[#allocation2 + $0xc8] sm:$0xff]  ;;  %v3977_v48 = vld [vmem:[#allocation5 + $0x1f0] sm:$0xff]  }
  0x60   :  { %v112_v1 = vld [vmem:[#allocation2 + $0xe8] sm:$0xff]  ;;  %v3099_v6 = vcombine.high %v107_v62, %v111_v63  ;;  %v115_v10 = vld [vmem:[#allocation2 + $0x100] sm:$0xff]  ;;  %v3098_v16 = vcombine.low %v107_v62, %v111_v63  ;;  %v3978_v49 = vld [vmem:[#allocation5 + $0x1b0] sm:$0xff]  }
  0x61   :  { %3327 = vmatpush3.bf16.msra.mxu0 %v3941_v22  ;;  %v3101_v8 = vcombine.high %v108_v0, %v112_v1  ;;  %v119_v11 = vld [vmem:[#allocation2 + $0x120] sm:$0xff]  ;;  %v116_v12 = vld [vmem:[#allocation2 + $0x108] sm:$0xff]  ;;  %v3100_v18 = vcombine.low %v108_v0, %v112_v1 }
  0x62   :  { %3439 = vmatpush3.bf16.msra.mxu1 %v3942_v23  ;;  %3328 = vmatprep.subr.bf16.mxu0 %v3943_v24  ;;  %v120_v13 = vld [vmem:[#allocation2 + $0x128] sm:$0xff]  ;;  %v3107_v19 = vcombine.high %v115_v10, %v119_v11  ;;  %v123_v22 = vld [vmem:[#allocation2 + $0x140] sm:$0xff] }
  0x63   :  { %3440 = vmatprep.subr.bf16.mxu1 %v3944_v25  ;;  %v3109_v21 = vcombine.high %v116_v12, %v120_v13  ;;  %v127_v23 = vld [vmem:[#allocation2 + $0x160] sm:$0xff]  ;;  %v124_v25 = vld [vmem:[#allocation2 + $0x148] sm:$0xff] }
  0x64   :  { %v3967_v24 = vld [vmem:[#allocation5 + $0x160] sm:$0xff]   ;;  %v3115_v32 = vcombine.high %v123_v22, %v127_v23  ;;  %v3971_v34 = vld [vmem:[#allocation5 + $0x168] sm:$0xff]  }
  0x65   :  { %3329 = vmatpush3.bf16.msra.mxu0 %v3945_v26  ;;  %v128_v26 = vld [vmem:[#allocation2 + $0x168] sm:$0xff]  ;;  %v143_v51 = vld [vmem:[#allocation2 + $0x1e0] sm:$0xff] }
  0x66   :  { %3441 = vmatpush3.bf16.msra.mxu1 %v3946_v27  ;;  %3330 = vmatprep.subr.bf16.mxu0 %v3947_v28  ;;  %v3968_v27 = vld [vmem:[#allocation5 + $0x120] sm:$0xff]   ;;  %v3117_v33 = vcombine.high %v124_v25, %v128_v26  ;;  %v3972_v36 = vld [vmem:[#allocation5 + $0x128] sm:$0xff]  }
  0x67   :  { %3442 = vmatprep.subr.bf16.mxu1 %v3948_v29  ;;  %v3969_v28 = vld [vmem:[#allocation5 + $0x1e0] sm:$0xff]   ;;  %v3973_v37 = vld [vmem:[#allocation5 + $0x1e8] sm:$0xff]  }
  0x68   :  { %v3970_v29 = vld [vmem:[#allocation5 + $0x1a0] sm:$0xff]   ;;  %v3974_v39 = vld [vmem:[#allocation5 + $0x1a8] sm:$0xff]  }
  0x69   :  { %3331 = vmatpush3.bf16.msra.mxu0 %v3949_v30  ;;  %v3106_v30 = vcombine.low %v115_v10, %v119_v11  ;;  %v140_v52 = vld [vmem:[#allocation2 + $0x1c8] sm:$0xff]  ;;  %v147_v62 = vld [vmem:[#allocation2 + $0x200] sm:$0xff] }
  0x6a   :  { %3443 = vmatpush3.bf16.msra.mxu1 %v3950_v31  ;;  %3540 = vmatprep.subr.bf16.mxu0 %v3951_v40  ;;  %v3108_v31 = vcombine.low %v116_v12, %v120_v13  ;;  %v132_v40 = vld [vmem:[#allocation2 + $0x188] sm:$0xff]  ;;  %v151_v63 = vld [vmem:[#allocation2 + $0x220] sm:$0xff] }
  0x6b   :  { %3652 = vmatprep.subr.bf16.mxu1 %v3953_v42  ;;  %v3114_v42 = vcombine.low %v123_v22, %v127_v23  ;;  %v144_v53 = vld [vmem:[#allocation2 + $0x1e8] sm:$0xff]  ;;  %v3138_v10 = vcombine.low %v147_v62, %v151_v63  ;;  %v171_v22 = vld [vmem:[#allocation2 + $0x2c0] sm:$0xff] }
  0x6c   :  { %1403 = vmatmul.mubr.bf16.vlgmr.msra.gmra.mrb[0].mxu0 %v3074_v35  ;;  %v131_v35 = vld [vmem:[#allocation2 + $0x180] sm:$0xff]  ;;  %v148_v0 = vld [vmem:[#allocation2 + $0x208] sm:$0xff] }
  0x6d   :  { %1564 = vmatmul.mubr.bf16.vlgmr.msra.gmra.mrb[0].mxu1 %v3076_v38  ;;  %3541 = vmatpush3.bf16.msra.mxu0 %v3952_v41  ;;  %v135_v38 = vld [vmem:[#allocation2 + $0x1a0] sm:$0xff]  ;;  %v136_v41 = vld [vmem:[#allocation2 + $0x1a8] sm:$0xff] }
  0x6e   :  { %3653 = vmatpush3.bf16.msra.mxu1 %v3954_v43  ;;  %1410 = vmatprep.mubr.bf16.mxu0 %v3083_v46  ;;  %v3116_v43 = vcombine.low %v124_v25, %v128_v26  ;;  %v3123_v44 = vcombine.high %v131_v35, %v135_v38  ;;  %v3125_v45 = vcombine.high %v132_v40, %v136_v41  ;;  %v3975_v46 = vld [vmem:[#allocation5 + $0x170] sm:$0xff]   ;;  %v152_v1 = vld [vmem:[#allocation2 + $0x228] sm:$0xff]  ;;  %v175_v23 = vld [vmem:[#allocation2 + $0x2e0] sm:$0xff] }
  0x6f   :  { %1571 = vmatprep.mubr.bf16.mxu1 %v3085_v50  ;;  %3542 = vmatprep.subr.bf16.mxu0 %v3955_v55  ;;  %v139_v50 = vld [vmem:[#allocation2 + $0x1c0] sm:$0xff]  ;;  %v3979_v55 = vld [vmem:[#allocation5 + $0x178] sm:$0xff]   ;;  %v3140_v11 = vcombine.low %v148_v0, %v152_v1  ;;  %v176_v25 = vld [vmem:[#allocation2 + $0x2e8] sm:$0xff] }
  0x70   :  { %3654 = vmatprep.subr.bf16.mxu1 %v3957_v60  ;;  %v3981_v60 = vld [vmem:[#allocation5 + $0x1f8] sm:$0xff]  }
  0x71   :  { %3543 = vmatpush3.bf16.msra.mxu0 %v3956_v58  ;;  %v3980_v58 = vld [vmem:[#allocation5 + $0x138] sm:$0xff]  }
  0x72   :  { %3655 = vmatpush3.bf16.msra.mxu1 %v3958_v61  ;;  %3544 = vmatprep.subr.bf16.mxu0 %v3959_v2  ;;  %v3982_v61 = vld [vmem:[#allocation5 + $0x1b8] sm:$0xff]   ;;  %v3130_v2 = vcombine.low %v139_v50, %v143_v51 }
  0x73   :  { %3656 = vmatprep.subr.bf16.mxu1 %v3961_v7  ;;  %v159_v7 = vld [vmem:[#allocation2 + $0x260] sm:$0xff] }
  0x74   :  { %1411 = vmatmul.mubr.bf16.gmra.mrb[4].mxu0 %v3082_v54  ;;  %v3122_v54 = vcombine.low %v131_v35, %v135_v38  ;;  %v187_v38 = vld [vmem:[#allocation2 + $0x340] sm:$0xff] }
  0x75   :  { %1572 = vmatmul.mubr.bf16.gmra.mrb[4].mxu1 %v3084_v56  ;;  %1418 = vmatprep.mubr.bf16.mxu0 %v3091_v57  ;;  %v3124_v56 = vcombine.low %v132_v40, %v136_v41  ;;  %v3131_v57 = vcombine.high %v139_v50, %v143_v51  ;;  %v188_v40 = vld [vmem:[#allocation2 + $0x348] sm:$0xff] }
  0x76   :  { %1579 = vmatprep.mubr.bf16.mxu1 %v3093_v59  ;;  %3545 = vmatpush3.bf16.msra.mxu0 %v3960_v4  ;;  %v3133_v59 = vcombine.high %v140_v52, %v144_v53  ;;  %v3139_v4 = vcombine.high %v147_v62, %v151_v63  ;;  %v192_v41 = vld [vmem:[#allocation2 + $0x368] sm:$0xff]  ;;  %v85_v62 = vld [vmem:[#allocation2 + $0x10] sm:$0xff] }
  0x77   :  { %3657 = vmatpush3.bf16.msra.mxu1 %v3962_v9  ;;  %3546 = vmatprep.subr.bf16.mxu0 %v3963_v14  ;;  %v160_v9 = vld [vmem:[#allocation2 + $0x268] sm:$0xff]  ;;  %v163_v14 = vld [vmem:[#allocation2 + $0x280] sm:$0xff]  ;;  %v3180_v51 = vcombine.low %v188_v40, %v192_v41  ;;  %v89_v63 = vld [vmem:[#allocation2 + $0x30] sm:$0xff] }
  0x78   :  { %3658 = vmatprep.subr.bf16.mxu1 %v3965_v17  ;;  %v168_v17 = vld [vmem:[#allocation2 + $0x2a8] sm:$0xff] }
  0x7a   :  { %3547 = vmatpush3.bf16.msra.mxu0 %v3964_v15  ;;  %v167_v15 = vld [vmem:[#allocation2 + $0x2a0] sm:$0xff] }
  0x7b   :  { %3659 = vmatpush3.bf16.msra.mxu1 %v3966_v20  ;;  %3548 = vmatprep.subr.bf16.mxu0 %v3967_v24  ;;  %v3155_v20 = vcombine.high %v163_v14, %v167_v15  ;;  %v172_v24 = vld [vmem:[#allocation2 + $0x2c8] sm:$0xff]  ;;  %v3154_v26 = vcombine.low %v163_v14, %v167_v15  ;;  %v101_v14 = vld [vmem:[#allocation2 + $0x90] sm:$0xff] }
  0x7c   :  { %1419 = vmatmul.mubr.bf16.gmra.mrb[8].mxu0 %v3090_v3  ;;  %3660 = vmatprep.subr.bf16.mxu1 %v3969_v28  ;;  %v3132_v3 = vcombine.low %v140_v52, %v144_v53  ;;  %v3163_v28 = vcombine.high %v171_v22, %v175_v23  ;;  %v3164_v35 = vcombine.low %v172_v24, %v176_v25  ;;  %v105_v15 = vld [vmem:[#allocation2 + $0xb0] sm:$0xff] }
  0x7d   :  { %1580 = vmatmul.mubr.bf16.gmra.mrb[8].mxu1 %v3092_v5  ;;  %1426 = vmatprep.mubr.bf16.mxu0 %v3099_v6  ;;  %v3141_v5 = vcombine.high %v148_v0, %v152_v1  ;;  %v155_v6 = vld [vmem:[#allocation2 + $0x240] sm:$0xff]  ;;  %v86_v0 = vld [vmem:[#allocation2 + $0x18] sm:$0xff] }
  0x7e   :  { %1587 = vmatprep.mubr.bf16.mxu1 %v3101_v8  ;;  %3549 = vmatpush3.bf16.msra.mxu0 %v3968_v27  ;;  %v156_v8 = vld [vmem:[#allocation2 + $0x248] sm:$0xff]  ;;  %v3147_v12 = vcombine.high %v155_v6, %v159_v7  ;;  %v90_v1 = vld [vmem:[#allocation2 + $0x38] sm:$0xff] }
  0x7f   :  { %3661 = vmatpush3.bf16.msra.mxu1 %v3970_v29  ;;  %3550 = vmatprep.subr.bf16.mxu0 %v3971_v34  ;;  %v3149_v13 = vcombine.high %v156_v8, %v160_v9  ;;  %v3165_v29 = vcombine.high %v172_v24, %v176_v25  ;;  %v3162_v34 = vcombine.low %v171_v22, %v175_v23  ;;  %v109_v22 = vld [vmem:[#allocation2 + $0xd0] sm:$0xff]  ;;  %v110_v24 = vld [vmem:[#allocation2 + $0xd8] sm:$0xff] }
  0x80   :  { %3662 = vmatprep.subr.bf16.mxu1 %v3973_v37  ;;  %v113_v23 = vld [vmem:[#allocation2 + $0xf0] sm:$0xff]  ;;  %v114_v25 = vld [vmem:[#allocation2 + $0xf8] sm:$0xff] }
  0x82   :  { %3551 = vmatpush3.bf16.msra.mxu0 %v3972_v36 }
  0x83   :  { %3663 = vmatpush3.bf16.msra.mxu1 %v3974_v39  ;;  %3552 = vmatprep.subr.bf16.mxu0 %v3975_v46  ;;  %v191_v39 = vld [vmem:[#allocation2 + $0x360] sm:$0xff] }
  0x84   :  { %1427 = vmatmul.mubr.bf16.gmra.mrb[12].mxu0 %v3098_v16  ;;  %3664 = vmatprep.subr.bf16.mxu1 %v3977_v48  ;;  %v164_v16 = vld [vmem:[#allocation2 + $0x288] sm:$0xff]  ;;  %v195_v46 = vld [vmem:[#allocation2 + $0x380] sm:$0xff]  ;;  %v3178_v50 = vcombine.low %v187_v38, %v191_v39 }
  0x85   :  { %1588 = vmatmul.mubr.bf16.gmra.mrb[12].mxu1 %v3100_v18  ;;  %1434 = vmatprep.mubr.bf16.mxu0 %v3107_v19  ;;  %v3146_v18 = vcombine.low %v155_v6, %v159_v7  ;;  %v3148_v19 = vcombine.low %v156_v8, %v160_v9  ;;  %v3156_v27 = vcombine.low %v164_v16, %v168_v17  ;;  %v196_v48 = vld [vmem:[#allocation2 + $0x388] sm:$0xff]  ;;  %v93_v6 = vld [vmem:[#allocation2 + $0x50] sm:$0xff]  ;;  %v94_v8 = vld [vmem:[#allocation2 + $0x58] sm:$0xff] }
  0x86   :  { %1595 = vmatprep.mubr.bf16.mxu1 %v3109_v21  ;;  %3553 = vmatpush3.bf16.msra.mxu0 %v3976_v47  ;;  %v3157_v21 = vcombine.high %v164_v16, %v168_v17  ;;  %v199_v47 = vld [vmem:[#allocation2 + $0x3a0] sm:$0xff]  ;;  %v97_v7 = vld [vmem:[#allocation2 + $0x70] sm:$0xff]  ;;  %v98_v9 = vld [vmem:[#allocation2 + $0x78] sm:$0xff] }
  0x87   :  { %3665 = vmatpush3.bf16.msra.mxu1 %v3978_v49  ;;  %3554 = vmatprep.subr.bf16.mxu0 %v3979_v55  ;;  %v200_v49 = vld [vmem:[#allocation2 + $0x3a8] sm:$0xff]  ;;  %v3187_v52 = vcombine.high %v195_v46, %v199_v47  ;;  %v207_v55 = vld [vmem:[#allocation2 + $0x3e0] sm:$0xff]  ;;  %v102_v16 = vld [vmem:[#allocation2 + $0x98] sm:$0xff] }
  0x88   :  { %3666 = vmatprep.subr.bf16.mxu1 %v3981_v60  ;;  %v3189_v53 = vcombine.high %v196_v48, %v200_v49  ;;  %v106_v17 = vld [vmem:[#allocation2 + $0xb8] sm:$0xff] }
  0x8a   :  { %3555 = vmatpush3.bf16.msra.mxu0 %v3980_v58  ;;  %v3186_v58 = vcombine.low %v195_v46, %v199_v47  ;;  %v133_v46 = vld [vmem:[#allocation2 + $0x190] sm:$0xff] }
  0x8b   :  { %3667 = vmatpush3.bf16.msra.mxu1 %v3982_v61  ;;  %v137_v47 = vld [vmem:[#allocation2 + $0x1b0] sm:$0xff] }
  0x8c   :  { %1435 = vmatmul.mubr.bf16.gmra.mrb[16].mxu0 %v3106_v30  ;;  %v179_v30 = vld [vmem:[#allocation2 + $0x300] sm:$0xff] }
  0x8d   :  { %1596 = vmatmul.mubr.bf16.gmra.mrb[16].mxu1 %v3108_v31  ;;  %1442 = vmatprep.mubr.bf16.mxu0 %v3115_v32  ;;  %v183_v31 = vld [vmem:[#allocation2 + $0x320] sm:$0xff]  ;;  %v180_v32 = vld [vmem:[#allocation2 + $0x308] sm:$0xff] }
  0x8e   :  { %1603 = vmatprep.mubr.bf16.mxu1 %v3117_v33  ;;  %v184_v33 = vld [vmem:[#allocation2 + $0x328] sm:$0xff]  ;;  %v3171_v36 = vcombine.high %v179_v30, %v183_v31 }
  0x8f   :  { %v3173_v37 = vcombine.high %v180_v32, %v184_v33 }
  0x94   :  { %1443 = vmatmul.mubr.bf16.gmra.mrb[20].mxu0 %v3114_v42  ;;  %v3170_v42 = vcombine.low %v179_v30, %v183_v31  ;;  %v117_v30 = vld [vmem:[#allocation2 + $0x110] sm:$0xff] }
  0x95   :  { %1604 = vmatmul.mubr.bf16.gmra.mrb[20].mxu1 %v3116_v43  ;;  %1450 = vmatprep.mubr.bf16.mxu0 %v3123_v44  ;;  %v3172_v43 = vcombine.low %v180_v32, %v184_v33  ;;  %v3179_v44 = vcombine.high %v187_v38, %v191_v39  ;;  %v121_v31 = vld [vmem:[#allocation2 + $0x130] sm:$0xff]  ;;  %v118_v32 = vld [vmem:[#allocation2 + $0x118] sm:$0xff] }
  0x96   :  { %1611 = vmatprep.mubr.bf16.mxu1 %v3125_v45  ;;  %v3181_v45 = vcombine.high %v188_v40, %v192_v41  ;;  %v122_v33 = vld [vmem:[#allocation2 + $0x138] sm:$0xff]  ;;  %v125_v38 = vld [vmem:[#allocation2 + $0x150] sm:$0xff] }
  0x97   :  { %v129_v39 = vld [vmem:[#allocation2 + $0x170] sm:$0xff]  ;;  %v126_v40 = vld [vmem:[#allocation2 + $0x158] sm:$0xff] }
  0x98   :  { %v130_v41 = vld [vmem:[#allocation2 + $0x178] sm:$0xff] }
  0x9c   :  { %1451 = vmatmul.mubr.bf16.gmra.mrb[24].mxu0 %v3122_v54  ;;  %v203_v54 = vld [vmem:[#allocation2 + $0x3c0] sm:$0xff] }
  0x9d   :  { %1612 = vmatmul.mubr.bf16.gmra.mrb[24].mxu1 %v3124_v56  ;;  %1458 = vmatprep.mubr.bf16.mxu0 %v3131_v57  ;;  %v204_v56 = vld [vmem:[#allocation2 + $0x3c8] sm:$0xff]  ;;  %v3195_v60 = vcombine.high %v203_v54, %v207_v55 }
  0x9e   :  { %1619 = vmatprep.mubr.bf16.mxu1 %v3133_v59  ;;  %v208_v57 = vld [vmem:[#allocation2 + $0x3e8] sm:$0xff]  ;;  %v3188_v59 = vcombine.low %v196_v48, %v200_v49  ;;  %v134_v48 = vld [vmem:[#allocation2 + $0x198] sm:$0xff] }
  0x9f   :  { %v3197_v61 = vcombine.high %v204_v56, %v208_v57  ;;  %v138_v49 = vld [vmem:[#allocation2 + $0x1b8] sm:$0xff] }
  0xa4   :  { %1459 = vmatmul.mubr.bf16.gmra.mrb[28].mxu0 %v3130_v2  ;;  %v3194_v2 = vcombine.low %v203_v54, %v207_v55  ;;  %v141_v54 = vld [vmem:[#allocation2 + $0x1d0] sm:$0xff] }
  0xa5   :  { %1620 = vmatmul.mubr.bf16.gmra.mrb[28].mxu1 %v3132_v3  ;;  %1466 = vmatprep.mubr.bf16.mxu0 %v3139_v4  ;;  %v3196_v3 = vcombine.low %v204_v56, %v208_v57  ;;  %v3079_v4 = vcombine.high %v85_v62, %v89_v63  ;;  %v145_v55 = vld [vmem:[#allocation2 + $0x1f0] sm:$0xff]  ;;  %v142_v56 = vld [vmem:[#allocation2 + $0x1d8] sm:$0xff] }
  0xa6   :  { %1627 = vmatprep.mubr.bf16.mxu1 %v3141_v5  ;;  %v3081_v5 = vcombine.high %v86_v0, %v90_v1  ;;  %v146_v57 = vld [vmem:[#allocation2 + $0x1f8] sm:$0xff] }
  0xac   :  { %1467 = vmatmul.mubr.bf16.gmra.mrb[32].mxu0 %v3138_v10  ;;  %v3078_v10 = vcombine.low %v85_v62, %v89_v63  ;;  %v149_v62 = vld [vmem:[#allocation2 + $0x210] sm:$0xff] }
  0xad   :  { %1628 = vmatmul.mubr.bf16.gmra.mrb[32].mxu1 %v3140_v11  ;;  %1474 = vmatprep.mubr.bf16.mxu0 %v3147_v12  ;;  %v3080_v11 = vcombine.low %v86_v0, %v90_v1  ;;  %v3087_v12 = vcombine.high %v93_v6, %v97_v7  ;;  %v153_v63 = vld [vmem:[#allocation2 + $0x230] sm:$0xff]  ;;  %v150_v0 = vld [vmem:[#allocation2 + $0x218] sm:$0xff] }
  0xae   :  { %1635 = vmatprep.mubr.bf16.mxu1 %v3149_v13  ;;  %v3089_v13 = vcombine.high %v94_v8, %v98_v9  ;;  %v154_v1 = vld [vmem:[#allocation2 + $0x238] sm:$0xff] }
  0xb4   :  { %1475 = vmatmul.mubr.bf16.gmra.mrb[36].mxu0 %v3146_v18  ;;  %v3086_v18 = vcombine.low %v93_v6, %v97_v7  ;;  %v157_v6 = vld [vmem:[#allocation2 + $0x250] sm:$0xff] }
  0xb5   :  { %1636 = vmatmul.mubr.bf16.gmra.mrb[36].mxu1 %v3148_v19  ;;  %1482 = vmatprep.mubr.bf16.mxu0 %v3155_v20  ;;  %v3088_v19 = vcombine.low %v94_v8, %v98_v9  ;;  %v3095_v20 = vcombine.high %v101_v14, %v105_v15  ;;  %v161_v7 = vld [vmem:[#allocation2 + $0x270] sm:$0xff]  ;;  %v158_v8 = vld [vmem:[#allocation2 + $0x258] sm:$0xff] }
  0xb6   :  { %1643 = vmatprep.mubr.bf16.mxu1 %v3157_v21  ;;  %v3097_v21 = vcombine.high %v102_v16, %v106_v17  ;;  %v162_v9 = vld [vmem:[#allocation2 + $0x278] sm:$0xff] }
  0xbc   :  { %1483 = vmatmul.mubr.bf16.gmra.mrb[40].mxu0 %v3154_v26  ;;  %v3094_v26 = vcombine.low %v101_v14, %v105_v15  ;;  %v3153_v14 = vcombine.high %v158_v8, %v162_v9  ;;  %v165_v15 = vld [vmem:[#allocation2 + $0x290] sm:$0xff] }
  0xbd   :  { %1644 = vmatmul.mubr.bf16.gmra.mrb[40].mxu1 %v3156_v27  ;;  %1490 = vmatprep.mubr.bf16.mxu0 %v3163_v28  ;;  %v3096_v27 = vcombine.low %v102_v16, %v106_v17  ;;  %v3103_v28 = vcombine.high %v109_v22, %v113_v23  ;;  %v169_v16 = vld [vmem:[#allocation2 + $0x2b0] sm:$0xff]  ;;  %v166_v17 = vld [vmem:[#allocation2 + $0x298] sm:$0xff] }
  0xbe   :  { %1651 = vmatprep.mubr.bf16.mxu1 %v3165_v29  ;;  %v3105_v29 = vcombine.high %v110_v24, %v114_v25 }
  0xc4   :  { %1491 = vmatmul.mubr.bf16.gmra.mrb[44].mxu0 %v3162_v34  ;;  %v3102_v34 = vcombine.low %v109_v22, %v113_v23  ;;  %v173_v23 = vld [vmem:[#allocation2 + $0x2d0] sm:$0xff] }
  0xc5   :  { %1652 = vmatmul.mubr.bf16.gmra.mrb[44].mxu1 %v3164_v35  ;;  %1498 = vmatprep.mubr.bf16.mxu0 %v3171_v36  ;;  %v3104_v35 = vcombine.low %v110_v24, %v114_v25  ;;  %v3111_v36 = vcombine.high %v117_v30, %v121_v31  ;;  %v177_v24 = vld [vmem:[#allocation2 + $0x2f0] sm:$0xff]  ;;  %v174_v25 = vld [vmem:[#allocation2 + $0x2d8] sm:$0xff] }
  0xc6   :  { %1659 = vmatprep.mubr.bf16.mxu1 %v3173_v37  ;;  %v3113_v37 = vcombine.high %v118_v32, %v122_v33 }
  0xcc   :  { %1499 = vmatmul.mubr.bf16.gmra.mrb[48].mxu0 %v3170_v42  ;;  %v3110_v42 = vcombine.low %v117_v30, %v121_v31  ;;  %v3167_v30 = vcombine.high %v173_v23, %v177_v24 }
  0xcd   :  { %1660 = vmatmul.mubr.bf16.gmra.mrb[48].mxu1 %v3172_v43  ;;  %1506 = vmatprep.mubr.bf16.mxu0 %v3179_v44  ;;  %v3112_v43 = vcombine.low %v118_v32, %v122_v33  ;;  %v3119_v44 = vcombine.high %v125_v38, %v129_v39  ;;  %v181_v32 = vld [vmem:[#allocation2 + $0x310] sm:$0xff] }
  0xce   :  { %1667 = vmatprep.mubr.bf16.mxu1 %v3181_v45  ;;  %v3121_v45 = vcombine.high %v126_v40, %v130_v41  ;;  %v185_v33 = vld [vmem:[#allocation2 + $0x330] sm:$0xff] }
  0xd4   :  { %1507 = vmatmul.mubr.bf16.gmra.mrb[52].mxu0 %v3178_v50  ;;  %v3118_v50 = vcombine.low %v125_v38, %v129_v39  ;;  %v4427_v38 = vld [vmem:[%s4975_s2] ss:$0 sm:$0xff] }
  0xd5   :  { %1668 = vmatmul.mubr.bf16.gmra.mrb[52].mxu1 %v3180_v51  ;;  %1514 = vmatprep.mubr.bf16.mxu0 %v3187_v52  ;;  %v3120_v51 = vcombine.low %v126_v40, %v130_v41  ;;  %v3127_v52 = vcombine.high %v133_v46, %v137_v47  ;;  %v3166_v40 = vcombine.low %v173_v23, %v177_v24 }
  0xd6   :  { %1675 = vmatprep.mubr.bf16.mxu1 %v3189_v53  ;;  %v3129_v53 = vcombine.high %v134_v48, %v138_v49 }
  0xdc   :  { %1515 = vmatmul.mubr.bf16.gmra.mrb[56].mxu0 %v3186_v58  ;;  %v3126_v58 = vcombine.low %v133_v46, %v137_v47 }
  0xdd   :  { %1676 = vmatmul.mubr.bf16.gmra.mrb[56].mxu1 %v3188_v59  ;;  %1522 = vmatprep.mubr.bf16.mxu0 %v3195_v60  ;;  %v3128_v59 = vcombine.low %v134_v48, %v138_v49  ;;  %v3135_v60 = vcombine.high %v141_v54, %v145_v55 }
  0xde   :  { %1683 = vmatprep.mubr.bf16.mxu1 %v3197_v61  ;;  %v3137_v61 = vcombine.high %v142_v56, %v146_v57 }
  0xe4   :  { %1523 = vmatmul.mubr.bf16.gmra.mrb[60].mxu0 %v3194_v2  ;;  %v3134_v2 = vcombine.low %v141_v54, %v145_v55 }
  0xe5   :  { %1684 = vmatmul.mubr.bf16.gmra.mrb[60].mxu1 %v3196_v3  ;;  %1724 = vmatprep.mubr.bf16.mxu0 %v3079_v4  ;;  %v3136_v3 = vcombine.low %v142_v56, %v146_v57  ;;  %v3143_v4 = vcombine.high %v149_v62, %v153_v63  ;;  %v189_v56 = vld [vmem:[#allocation2 + $0x350] sm:$0xff] }
  0xe6   :  { %1885 = vmatprep.mubr.bf16.mxu1 %v3081_v5  ;;  %v3145_v5 = vcombine.high %v150_v0, %v154_v1  ;;  %v193_v57 = vld [vmem:[#allocation2 + $0x370] sm:$0xff] }
  0xe7   :  { %v3182_v24 = vcombine.low %v189_v56, %v193_v57 }
  0xec   :  { %1725 = vmatmul.mubr.bf16.vlgmr.msra.gmra.mrb[64].mxu0 %v3078_v10  ;;  %v3142_v10 = vcombine.low %v149_v62, %v153_v63 }
  0xed   :  { %1886 = vmatmul.mubr.bf16.vlgmr.msra.gmra.mrb[64].mxu1 %v3080_v11  ;;  %1732 = vmatprep.mubr.bf16.mxu0 %v3087_v12  ;;  %v3983_v11 = vld [vmem:[#allocation7] sm:$0xff]   ;;  %v3144_v12 = vcombine.low %v150_v0, %v154_v1  ;;  %v3174_v0 = vcombine.low %v181_v32, %v185_v33 }
  0xee   :  { %1893 = vmatprep.mubr.bf16.mxu1 %v3089_v13  ;;  %v3151_v13 = vcombine.high %v157_v6, %v161_v7  ;;  %3812 = vmatprep.subr.bf16.mxu0 %v3983_v11 }
  0xef   :  { %3813 = vmatpush3.bf16.msra.mxu0 %v3983_v11 }
  0xf4   :  { %1733 = vmatmul.mubr.bf16.gmra.mrb[68].mxu0 %v3086_v18  ;;  %v170_v18 = vld [vmem:[#allocation2 + $0x2b8] sm:$0xff] }
  0xf5   :  { %1894 = vmatmul.mubr.bf16.gmra.mrb[68].mxu1 %v3088_v19  ;;  %1740 = vmatprep.mubr.bf16.mxu0 %v3095_v20  ;;  %v3150_v19 = vcombine.low %v157_v6, %v161_v7  ;;  %v3152_v20 = vcombine.low %v158_v8, %v162_v9  ;;  %v3161_v22 = vcombine.high %v166_v17, %v170_v18 }
  0xf6   :  { %1901 = vmatprep.mubr.bf16.mxu1 %v3097_v21  ;;  %v3159_v21 = vcombine.high %v165_v15, %v169_v16 }
  0xfc   :  { %1741 = vmatmul.mubr.bf16.gmra.mrb[72].mxu0 %v3094_v26  ;;  %v178_v26 = vld [vmem:[#allocation2 + $0x2f8] sm:$0xff] }
  0xfd   :  { %1902 = vmatmul.mubr.bf16.gmra.mrb[72].mxu1 %v3096_v27  ;;  %1748 = vmatprep.mubr.bf16.mxu0 %v3103_v28  ;;  %v3158_v27 = vcombine.low %v165_v15, %v169_v16  ;;  %v3984_v28 = vld [vmem:[#allocation7 + $0x8] sm:$0xff]   ;;  %v3169_v31 = vcombine.high %v174_v25, %v178_v26  ;;  %v197_v16 = vld [vmem:[#allocation2 + $0x390] sm:$0xff] }
  0xfe   :  { %1909 = vmatprep.mubr.bf16.mxu1 %v3105_v29  ;;  %v3160_v29 = vcombine.low %v166_v17, %v170_v18  ;;  %3814 = vmatprep.subr.bf16.mxu0 %v3984_v28  ;;  %v201_v17 = vld [vmem:[#allocation2 + $0x3b0] sm:$0xff] }
  0xff   :  { %3815 = vmatpush3.bf16.msra.mxu0 %v3984_v28 }
 0x104   :  { %1749 = vmatmul.mubr.bf16.gmra.mrb[76].mxu0 %v3102_v34 }
 0x105   :  { %1910 = vmatmul.mubr.bf16.gmra.mrb[76].mxu1 %v3104_v35  ;;  %1756 = vmatprep.mubr.bf16.mxu0 %v3111_v36  ;;  %v182_v35 = vld [vmem:[#allocation2 + $0x318] sm:$0xff] }
 0x106   :  { %1917 = vmatprep.mubr.bf16.mxu1 %v3113_v37  ;;  %v186_v36 = vld [vmem:[#allocation2 + $0x338] sm:$0xff] }
 0x107   :  { %v3177_v49 = vcombine.high %v182_v35, %v186_v36 }
 0x10c   :  { %1757 = vmatmul.mubr.bf16.gmra.mrb[80].mxu0 %v3110_v42 }
 0x10d   :  { %1918 = vmatmul.mubr.bf16.gmra.mrb[80].mxu1 %v3112_v43  ;;  %1764 = vmatprep.mubr.bf16.mxu0 %v3119_v44  ;;  %v3168_v44 = vcombine.low %v174_v25, %v178_v26 }
 0x10e   :  { %1925 = vmatprep.mubr.bf16.mxu1 %v3121_v45  ;;  %v3175_v45 = vcombine.high %v181_v32, %v185_v33 }
 0x114   :  { %1765 = vmatmul.mubr.bf16.gmra.mrb[84].mxu0 %v3118_v50 }
 0x115   :  { %1926 = vmatmul.mubr.bf16.gmra.mrb[84].mxu1 %v3120_v51  ;;  %1772 = vmatprep.mubr.bf16.mxu0 %v3127_v52 }
 0x116   :  { %1933 = vmatprep.mubr.bf16.mxu1 %v3129_v53 }
 0x11c   :  { %1773 = vmatmul.mubr.bf16.gmra.mrb[88].mxu0 %v3126_v58 }
 0x11d   :  { %1934 = vmatmul.mubr.bf16.gmra.mrb[88].mxu1 %v3128_v59  ;;  %1780 = vmatprep.mubr.bf16.mxu0 %v3135_v60  ;;  %v190_v60 = vld [vmem:[#allocation2 + $0x358] sm:$0xff] }
 0x11e   :  { %1941 = vmatprep.mubr.bf16.mxu1 %v3137_v61  ;;  %v194_v61 = vld [vmem:[#allocation2 + $0x378] sm:$0xff] }
 0x11f   :  { %v3185_v9 = vcombine.high %v190_v60, %v194_v61  ;;  %v3184_v28 = vcombine.low %v190_v60, %v194_v61 }
 0x124   :  { %1781 = vmatmul.mubr.bf16.gmra.mrb[92].mxu0 %v3134_v2 }
 0x125   :  { %1942 = vmatmul.mubr.bf16.gmra.mrb[92].mxu1 %v3136_v3  ;;  %1788 = vmatprep.mubr.bf16.mxu0 %v3143_v4  ;;  %v3176_v4 = vcombine.low %v182_v35, %v186_v36 }
 0x126   :  { %1949 = vmatprep.mubr.bf16.mxu1 %v3145_v5  ;;  %v3183_v5 = vcombine.high %v189_v56, %v193_v57 }
 0x12c   :  { %1789 = vmatmul.mubr.bf16.gmra.mrb[96].mxu0 %v3142_v10 }
 0x12d   :  { %1950 = vmatmul.mubr.bf16.gmra.mrb[96].mxu1 %v3144_v12  ;;  %1796 = vmatprep.mubr.bf16.mxu0 %v3151_v13 }
 0x12e   :  { %1957 = vmatprep.mubr.bf16.mxu1 %v3153_v14 }
 0x134   :  { %1797 = vmatmul.mubr.bf16.gmra.mrb[100].mxu0 %v3150_v19 }
 0x135   :  { %1958 = vmatmul.mubr.bf16.gmra.mrb[100].mxu1 %v3152_v20  ;;  %1804 = vmatprep.mubr.bf16.mxu0 %v3159_v21  ;;  %v198_v20 = vld [vmem:[#allocation2 + $0x398] sm:$0xff] }
 0x136   :  { %1965 = vmatprep.mubr.bf16.mxu1 %v3161_v22  ;;  %v202_v21 = vld [vmem:[#allocation2 + $0x3b8] sm:$0xff] }
 0x137   :  { %v3193_v33 = vcombine.high %v198_v20, %v202_v21 }
 0x13c   :  { %1805 = vmatmul.mubr.bf16.gmra.mrb[104].mxu0 %v3158_v27 }
 0x13d   :  { %1966 = vmatmul.mubr.bf16.gmra.mrb[104].mxu1 %v3160_v29  ;;  %1812 = vmatprep.mubr.bf16.mxu0 %v3167_v30  ;;  %v3191_v29 = vcombine.high %v197_v16, %v201_v17 }
 0x13e   :  { %1973 = vmatprep.mubr.bf16.mxu1 %v3169_v31 }
 0x13f   :  { %v3332_v34 = vpop.f32.mrb[0].mxu0 }
 0x140   :  { %v3444_v37 = vpop.f32.mrb[0].mxu1  ;;  %v3333_v39 = vpop.f32.mrb[1].mxu0 }
 0x141   :  { %v3334_v41 = vadd.f32 %v3333_v39, %v3332_v34  ;;  %v3445_v42 = vpop.f32.mrb[1].mxu1  ;;  %v3335_v43 = vpop.f32.mrb[2].mxu0 }
 0x142   :  { %v3446_v46 = vadd.f32 %v3445_v42, %v3444_v37  ;;  %v3447_v47 = vpop.f32.mrb[2].mxu1  ;;  %v3336_v48 = vpop.f32.mrb[3].mxu0  ;;  %v209_v42 = vld [vmem:[#allocation2 + $0x3f0] sm:$0xff] }
 0x143   :  { %v1405_v50 = vadd.f32 %v3334_v41, %v4427_v38  ;;  %v3337_v51 = vadd.f32 %v3336_v48, %v3335_v43  ;;  %v3448_v52 = vpop.f32.mrb[3].mxu1  ;;  %v205_v41 = vld [vmem:[#allocation2 + $0x3d0] sm:$0xff] }
 0x144   :  { %v3449_v53 = vadd.f32 %v3448_v52, %v3447_v47  ;;  %1813 = vmatmul.mubr.bf16.gmra.mrb[108].mxu0 %v3166_v40  ;;  %v3985_v43 = vld [vmem:[#allocation7 + $0x10] sm:$0xff]   ;;  %v210_v47 = vld [vmem:[#allocation2 + $0x3f8] sm:$0xff]  ;;  %v3199_v56 = vcombine.high %v205_v41, %v209_v42 }
 0x145   :  { %v4430_v54 = vadd.f32 %v3446_v46, %v1405_v50  ;;  %v1408_v55 = vadd.f32 %v3337_v51, %v4427_v38  ;;  %1974 = vmatmul.mubr.bf16.gmra.mrb[108].mxu1 %v3168_v44  ;;  %1820 = vmatprep.mubr.bf16.mxu0 %v3175_v45  ;;  %v206_v46 = vld [vmem:[#allocation2 + $0x3d8] sm:$0xff]  ;;  %v3190_v50 = vcombine.low %v197_v16, %v201_v17 }
 0x146   :  { %1981 = vmatprep.mubr.bf16.mxu1 %v3177_v49  ;;  %3816 = vmatprep.subr.bf16.mxu0 %v3985_v43  ;;  %v3201_v61 = vcombine.high %v206_v46, %v210_v47 }
 0x147   :  { %v4433_v58 = vadd.f32 %v3449_v53, %v1408_v55  ;;  %v3338_v59 = vpop.f32.mrb[4].mxu0  ;;  %v3192_v55 = vcombine.low %v198_v20, %v202_v21  ;;  %3817 = vmatpush3.bf16.msra.mxu0 %v3985_v43  ;;  %v3988_v20 = vld [vmem:[#allocation7 + $0x28] sm:$0xff]  }
 0x148   :  { %v3450_v62 = vpop.f32.mrb[4].mxu1  ;;  %v3339_v63 = vpop.f32.mrb[5].mxu0 }
 0x149   :  { %v3340_v1 = vadd.f32 %v3339_v63, %v3338_v59  ;;  %v3451_v2 = vpop.f32.mrb[5].mxu1  ;;  %v3341_v3 = vpop.f32.mrb[6].mxu0 }
 0x14a   :  { %v3452_v6 = vadd.f32 %v3451_v2, %v3450_v62  ;;  %v3453_v7 = vpop.f32.mrb[6].mxu1  ;;  %v3342_v8 = vpop.f32.mrb[7].mxu0  ;;  %v3986_v62 = vld [vmem:[#allocation7 + $0x18] sm:$0xff]  }
 0x14b   :  { %v1413_v10 = vadd.f32 %v3340_v1, %v4427_v38  ;;  %v3343_v11 = vadd.f32 %v3342_v8, %v3341_v3  ;;  %v3454_v12 = vpop.f32.mrb[7].mxu1  ;;  %3818 = vmatprep.subr.bf16.mxu0 %v3986_v62 }
 0x14c   :  { %v3455_v13 = vadd.f32 %v3454_v12, %v3453_v7  ;;  %1821 = vmatmul.mubr.bf16.gmra.mrb[112].mxu0 %v3174_v0 }
 0x14d   :  { %v4436_v14 = vadd.f32 %v3452_v6, %v1413_v10  ;;  %v1416_v15 = vadd.f32 %v3343_v11, %v4427_v38  ;;  %1982 = vmatmul.mubr.bf16.gmra.mrb[112].mxu1 %v3176_v4  ;;  %1828 = vmatprep.mubr.bf16.mxu0 %v3183_v5  ;;  %v3987_v5 = vld [vmem:[#allocation7 + $0x20] sm:$0xff]   ;;  %v3198_v10 = vcombine.low %v205_v41, %v209_v42 }
 0x14e   :  { %1989 = vmatprep.mubr.bf16.mxu1 %v3185_v9  ;;  %3819 = vmatpush3.bf16.msra.mxu0 %v3986_v62 }
 0x14f   :  { %v4439_v18 = vadd.f32 %v3455_v13, %v1416_v15  ;;  %v3344_v19 = vpop.f32.mrb[8].mxu0  ;;  %3820 = vmatprep.subr.bf16.mxu0 %v3987_v5  ;;  %v3200_v15 = vcombine.low %v206_v46, %v210_v47 }
 0x150   :  { %v3456_v22 = vpop.f32.mrb[8].mxu1  ;;  %v3345_v23 = vpop.f32.mrb[9].mxu0 }
 0x151   :  { %v3346_v25 = vadd.f32 %v3345_v23, %v3344_v19  ;;  %v3457_v26 = vpop.f32.mrb[9].mxu1  ;;  %v3347_v27 = vpop.f32.mrb[10].mxu0 }
 0x152   :  { %v3458_v30 = vadd.f32 %v3457_v26, %v3456_v22  ;;  %v3459_v31 = vpop.f32.mrb[10].mxu1  ;;  %v3348_v32 = vpop.f32.mrb[11].mxu0  ;;  %3821 = vmatpush3.bf16.msra.mxu0 %v3987_v5 }
 0x153   :  { %v1421_v34 = vadd.f32 %v3346_v25, %v4427_v38  ;;  %v3349_v35 = vadd.f32 %v3348_v32, %v3347_v27  ;;  %v3460_v36 = vpop.f32.mrb[11].mxu1  ;;  %3822 = vmatprep.subr.bf16.mxu0 %v3988_v20  ;;  %v3989_v27 = vld [vmem:[#allocation7 + $0x30] sm:$0xff]  }
 0x154   :  { %v3461_v37 = vadd.f32 %v3460_v36, %v3459_v31  ;;  %1829 = vmatmul.mubr.bf16.gmra.mrb[116].mxu0 %v3182_v24 }
 0x155   :  { %v4442_v39 = vadd.f32 %v3458_v30, %v1421_v34  ;;  %v1424_v40 = vadd.f32 %v3349_v35, %v4427_v38  ;;  %1990 = vmatmul.mubr.bf16.gmra.mrb[116].mxu1 %v3184_v28  ;;  %1836 = vmatprep.mubr.bf16.mxu0 %v3191_v29 }
 0x156   :  { %1997 = vmatprep.mubr.bf16.mxu1 %v3193_v33  ;;  %3823 = vmatpush3.bf16.msra.mxu0 %v3988_v20 }
 0x157   :  { %v4445_v44 = vadd.f32 %v3461_v37, %v1424_v40  ;;  %v3350_v45 = vpop.f32.mrb[12].mxu0  ;;  %3824 = vmatprep.subr.bf16.mxu0 %v3989_v27  ;;  %v3990_v40 = vld [vmem:[#allocation7 + $0x38] sm:$0xff]  }
 0x158   :  { %v3462_v48 = vpop.f32.mrb[12].mxu1  ;;  %v3351_v49 = vpop.f32.mrb[13].mxu0 }
 0x159   :  { %v3352_v51 = vadd.f32 %v3351_v49, %v3350_v45  ;;  %v3463_v52 = vpop.f32.mrb[13].mxu1  ;;  %v3353_v53 = vpop.f32.mrb[14].mxu0 }
 0x15a   :  { %v3464_v57 = vadd.f32 %v3463_v52, %v3462_v48  ;;  %v3465_v59 = vpop.f32.mrb[14].mxu1  ;;  %v3354_v60 = vpop.f32.mrb[15].mxu0  ;;  %3825 = vmatpush3.bf16.msra.mxu0 %v3989_v27 }
 0x15b   :  { %v1429_v63 = vadd.f32 %v3352_v51, %v4427_v38  ;;  %v3355_v0 = vadd.f32 %v3354_v60, %v3353_v53  ;;  %v3466_v1 = vpop.f32.mrb[15].mxu1  ;;  %3826 = vmatprep.subr.bf16.mxu0 %v3990_v40 }
 0x15c   :  { %v3467_v2 = vadd.f32 %v3466_v1, %v3465_v59  ;;  %1837 = vmatmul.mubr.bf16.gmra.mrb[120].mxu0 %v3190_v50 }
 0x15d   :  { %v4448_v3 = vadd.f32 %v3464_v57, %v1429_v63  ;;  %v1432_v4 = vadd.f32 %v3355_v0, %v4427_v38  ;;  %1998 = vmatmul.mubr.bf16.gmra.mrb[120].mxu1 %v3192_v55  ;;  %1844 = vmatprep.mubr.bf16.mxu0 %v3199_v56 }
 0x15e   :  { %2005 = vmatprep.mubr.bf16.mxu1 %v3201_v61  ;;  %3827 = vmatpush3.bf16.msra.mxu0 %v3990_v40 }
 0x15f   :  { %v4451_v6 = vadd.f32 %v3467_v2, %v1432_v4  ;;  %v3356_v7 = vpop.f32.mrb[16].mxu0 }
 0x160   :  { %v3468_v8 = vpop.f32.mrb[16].mxu1  ;;  %v3357_v9 = vpop.f32.mrb[17].mxu0 }
 0x161   :  { %v3358_v11 = vadd.f32 %v3357_v9, %v3356_v7  ;;  %v3469_v12 = vpop.f32.mrb[17].mxu1  ;;  %v3359_v13 = vpop.f32.mrb[18].mxu0 }
 0x162   :  { %v3470_v16 = vadd.f32 %v3469_v12, %v3468_v8  ;;  %v3471_v17 = vpop.f32.mrb[18].mxu1  ;;  %v3360_v19 = vpop.f32.mrb[19].mxu0 }
 0x163   :  { %v1437_v21 = vadd.f32 %v3358_v11, %v4427_v38  ;;  %v3361_v22 = vadd.f32 %v3360_v19, %v3359_v13  ;;  %v3472_v23 = vpop.f32.mrb[19].mxu1 }
 0x164   :  { %v3473_v24 = vadd.f32 %v3472_v23, %v3471_v17  ;;  %1845 = vmatmul.mubr.bf16.gmra.mrb[124].mxu0 %v3198_v10 }
 0x165   :  { %v4454_v25 = vadd.f32 %v3470_v16, %v1437_v21  ;;  %v1440_v26 = vadd.f32 %v3361_v22, %v4427_v38  ;;  %2006 = vmatmul.mubr.bf16.gmra.mrb[124].mxu1 %v3200_v15 }
 0x167   :  { %v4457_v28 = vadd.f32 %v3473_v24, %v1440_v26  ;;  %v3362_v29 = vpop.f32.mrb[20].mxu0 }
 0x168   :  { %v3474_v30 = vpop.f32.mrb[20].mxu1  ;;  %v3363_v31 = vpop.f32.mrb[21].mxu0 }
 0x169   :  { %v3364_v32 = vadd.f32 %v3363_v31, %v3362_v29  ;;  %v3475_v33 = vpop.f32.mrb[21].mxu1  ;;  %v3365_v34 = vpop.f32.mrb[22].mxu0 }
 0x16a   :  { %v3476_v35 = vadd.f32 %v3475_v33, %v3474_v30  ;;  %v3477_v36 = vpop.f32.mrb[22].mxu1  ;;  %v3366_v37 = vpop.f32.mrb[23].mxu0 }
 0x16b   :  { %v1445_v41 = vadd.f32 %v3364_v32, %v4427_v38  ;;  %v3367_v42 = vadd.f32 %v3366_v37, %v3365_v34  ;;  %v3478_v43 = vpop.f32.mrb[23].mxu1 }
 0x16c   :  { %v3479_v45 = vadd.f32 %v3478_v43, %v3477_v36 }
 0x16d   :  { %v4460_v46 = vadd.f32 %v3476_v35, %v1445_v41  ;;  %v1448_v47 = vadd.f32 %v3367_v42, %v4427_v38 }
 0x16f   :  { %v4463_v48 = vadd.f32 %v3479_v45, %v1448_v47  ;;  %v3368_v49 = vpop.f32.mrb[24].mxu0 }
 0x170   :  { %v3480_v50 = vpop.f32.mrb[24].mxu1  ;;  %v3369_v51 = vpop.f32.mrb[25].mxu0 }
 0x171   :  { %v3370_v52 = vadd.f32 %v3369_v51, %v3368_v49  ;;  %v3481_v53 = vpop.f32.mrb[25].mxu1  ;;  %v3371_v55 = vpop.f32.mrb[26].mxu0 }
 0x172   :  { %v3482_v56 = vadd.f32 %v3481_v53, %v3480_v50  ;;  %v3483_v57 = vpop.f32.mrb[26].mxu1  ;;  %v3372_v59 = vpop.f32.mrb[27].mxu0 }
 0x173   :  { %v1453_v60 = vadd.f32 %v3370_v52, %v4427_v38  ;;  %v3373_v61 = vadd.f32 %v3372_v59, %v3371_v55  ;;  %v3484_v62 = vpop.f32.mrb[27].mxu1 }
 0x174   :  { %v3485_v63 = vadd.f32 %v3484_v62, %v3483_v57 }
 0x175   :  { %v4466_v0 = vadd.f32 %v3482_v56, %v1453_v60  ;;  %v1456_v1 = vadd.f32 %v3373_v61, %v4427_v38 }
 0x177   :  { %v4469_v2 = vadd.f32 %v3485_v63, %v1456_v1  ;;  %v3374_v4 = vpop.f32.mrb[28].mxu0 }
 0x178   :  { %v3486_v5 = vpop.f32.mrb[28].mxu1  ;;  %v3375_v7 = vpop.f32.mrb[29].mxu0 }
 0x179   :  { %v3376_v8 = vadd.f32 %v3375_v7, %v3374_v4  ;;  %v3487_v9 = vpop.f32.mrb[29].mxu1  ;;  %v3377_v10 = vpop.f32.mrb[30].mxu0 }
 0x17a   :  { %v3488_v11 = vadd.f32 %v3487_v9, %v3486_v5  ;;  %v3489_v12 = vpop.f32.mrb[30].mxu1  ;;  %v3378_v13 = vpop.f32.mrb[31].mxu0 }
 0x17b   :  { %v1461_v15 = vadd.f32 %v3376_v8, %v4427_v38  ;;  %v3379_v16 = vadd.f32 %v3378_v13, %v3377_v10  ;;  %v3490_v17 = vpop.f32.mrb[31].mxu1 }
 0x17c   :  { %v3491_v19 = vadd.f32 %v3490_v17, %v3489_v12 }
 0x17d   :  { %v4472_v20 = vadd.f32 %v3488_v11, %v1461_v15  ;;  %v1464_v21 = vadd.f32 %v3379_v16, %v4427_v38 }
 0x17f   :  { %v4475_v22 = vadd.f32 %v3491_v19, %v1464_v21  ;;  %v3380_v23 = vpop.f32.mrb[32].mxu0 }
 0x180   :  { %v3492_v24 = vpop.f32.mrb[32].mxu1  ;;  %v3381_v26 = vpop.f32.mrb[33].mxu0 }
 0x181   :  { %v3382_v27 = vadd.f32 %v3381_v26, %v3380_v23  ;;  %v3493_v29 = vpop.f32.mrb[33].mxu1  ;;  %v3383_v30 = vpop.f32.mrb[34].mxu0 }
 0x182   :  { %v3494_v31 = vadd.f32 %v3493_v29, %v3492_v24  ;;  %v3495_v32 = vpop.f32.mrb[34].mxu1  ;;  %v3384_v33 = vpop.f32.mrb[35].mxu0 }
 0x183   :  { %v1469_v34 = vadd.f32 %v3382_v27, %v4427_v38  ;;  %v3385_v35 = vadd.f32 %v3384_v33, %v3383_v30  ;;  %v3496_v36 = vpop.f32.mrb[35].mxu1 }
 0x184   :  { %v3497_v37 = vadd.f32 %v3496_v36, %v3495_v32 }
 0x185   :  { %v4478_v40 = vadd.f32 %v3494_v31, %v1469_v34  ;;  %v1472_v41 = vadd.f32 %v3385_v35, %v4427_v38 }
 0x187   :  { %v4481_v42 = vadd.f32 %v3497_v37, %v1472_v41  ;;  %v3386_v43 = vpop.f32.mrb[36].mxu0 }
 0x188   :  { %v3498_v45 = vpop.f32.mrb[36].mxu1  ;;  %v3387_v47 = vpop.f32.mrb[37].mxu0 }
 0x189   :  { %v3388_v49 = vadd.f32 %v3387_v47, %v3386_v43  ;;  %v3499_v50 = vpop.f32.mrb[37].mxu1  ;;  %v3389_v51 = vpop.f32.mrb[38].mxu0 }
 0x18a   :  { %v3500_v52 = vadd.f32 %v3499_v50, %v3498_v45  ;;  %v3501_v53 = vpop.f32.mrb[38].mxu1  ;;  %v3390_v55 = vpop.f32.mrb[39].mxu0 }
 0x18b   :  { %v1477_v56 = vadd.f32 %v3388_v49, %v4427_v38  ;;  %v3391_v57 = vadd.f32 %v3390_v55, %v3389_v51  ;;  %v3502_v59 = vpop.f32.mrb[39].mxu1 }
 0x18c   :  { %v3503_v60 = vadd.f32 %v3502_v59, %v3501_v53 }
 0x18d   :  { %v4484_v61 = vadd.f32 %v3500_v52, %v1477_v56  ;;  %v1480_v62 = vadd.f32 %v3391_v57, %v4427_v38 }
 0x18f   :  { %v4487_v63 = vadd.f32 %v3503_v60, %v1480_v62  ;;  %v3392_v1 = vpop.f32.mrb[40].mxu0 }
 0x190   :  { %v3504_v4 = vpop.f32.mrb[40].mxu1  ;;  %v3393_v5 = vpop.f32.mrb[41].mxu0 }
 0x191   :  { %v3394_v7 = vadd.f32 %v3393_v5, %v3392_v1  ;;  %v3505_v8 = vpop.f32.mrb[41].mxu1  ;;  %v3395_v9 = vpop.f32.mrb[42].mxu0 }
 0x192   :  { %v3506_v10 = vadd.f32 %v3505_v8, %v3504_v4  ;;  %v3507_v11 = vpop.f32.mrb[42].mxu1  ;;  %v3396_v12 = vpop.f32.mrb[43].mxu0 }
 0x193   :  { %v1485_v13 = vadd.f32 %v3394_v7, %v4427_v38  ;;  %v3397_v15 = vadd.f32 %v3396_v12, %v3395_v9  ;;  %v3508_v16 = vpop.f32.mrb[43].mxu1 }
 0x194   :  { %v3509_v17 = vadd.f32 %v3508_v16, %v3507_v11 }
 0x195   :  { %v4490_v19 = vadd.f32 %v3506_v10, %v1485_v13  ;;  %v1488_v21 = vadd.f32 %v3397_v15, %v4427_v38 }
 0x197   :  { %v4493_v23 = vadd.f32 %v3509_v17, %v1488_v21  ;;  %v3398_v24 = vpop.f32.mrb[44].mxu0 }
 0x198   :  { %v3510_v26 = vpop.f32.mrb[44].mxu1  ;;  %v3399_v27 = vpop.f32.mrb[45].mxu0 }
 0x199   :  { %v3400_v29 = vadd.f32 %v3399_v27, %v3398_v24  ;;  %v3511_v30 = vpop.f32.mrb[45].mxu1  ;;  %v3401_v31 = vpop.f32.mrb[46].mxu0 }
 0x19a   :  { %v3512_v32 = vadd.f32 %v3511_v30, %v3510_v26  ;;  %v3513_v33 = vpop.f32.mrb[46].mxu1  ;;  %v3402_v34 = vpop.f32.mrb[47].mxu0 }
 0x19b   :  { %v1493_v35 = vadd.f32 %v3400_v29, %v4427_v38  ;;  %v3403_v36 = vadd.f32 %v3402_v34, %v3401_v31  ;;  %v3514_v37 = vpop.f32.mrb[47].mxu1 }
 0x19c   :  { %v3515_v41 = vadd.f32 %v3514_v37, %v3513_v33 }
 0x19d   :  { %v4496_v43 = vadd.f32 %v3512_v32, %v1493_v35  ;;  %v1496_v45 = vadd.f32 %v3403_v36, %v4427_v38 }
 0x19f   :  { %v4499_v47 = vadd.f32 %v3515_v41, %v1496_v45  ;;  %v3404_v49 = vpop.f32.mrb[48].mxu0 }
 0x1a0   :  { %v3516_v50 = vpop.f32.mrb[48].mxu1  ;;  %v3405_v51 = vpop.f32.mrb[49].mxu0 }
 0x1a1   :  { %v3406_v52 = vadd.f32 %v3405_v51, %v3404_v49  ;;  %v3517_v53 = vpop.f32.mrb[49].mxu1  ;;  %v3407_v55 = vpop.f32.mrb[50].mxu0 }
 0x1a2   :  { %v3518_v56 = vadd.f32 %v3517_v53, %v3516_v50  ;;  %v3519_v57 = vpop.f32.mrb[50].mxu1  ;;  %v3408_v59 = vpop.f32.mrb[51].mxu0 }
 0x1a3   :  { %v1501_v60 = vadd.f32 %v3406_v52, %v4427_v38  ;;  %v3409_v62 = vadd.f32 %v3408_v59, %v3407_v55  ;;  %v3520_v1 = vpop.f32.mrb[51].mxu1 }
 0x1a4   :  { %v3521_v4 = vadd.f32 %v3520_v1, %v3519_v57 }
 0x1a5   :  { %v4502_v5 = vadd.f32 %v3518_v56, %v1501_v60  ;;  %v1504_v7 = vadd.f32 %v3409_v62, %v4427_v38 }
 0x1a7   :  { %v4505_v8 = vadd.f32 %v3521_v4, %v1504_v7  ;;  %v3410_v9 = vpop.f32.mrb[52].mxu0 }
 0x1a8   :  { %v3522_v10 = vpop.f32.mrb[52].mxu1  ;;  %v3411_v11 = vpop.f32.mrb[53].mxu0 }
 0x1a9   :  { %v3412_v12 = vadd.f32 %v3411_v11, %v3410_v9  ;;  %v3523_v13 = vpop.f32.mrb[53].mxu1  ;;  %v3413_v15 = vpop.f32.mrb[54].mxu0 }
 0x1aa   :  { %v3524_v16 = vadd.f32 %v3523_v13, %v3522_v10  ;;  %v3525_v17 = vpop.f32.mrb[54].mxu1  ;;  %v3414_v21 = vpop.f32.mrb[55].mxu0 }
 0x1ab   :  { %v1509_v24 = vadd.f32 %v3412_v12, %v4427_v38  ;;  %v3415_v26 = vadd.f32 %v3414_v21, %v3413_v15  ;;  %v3526_v27 = vpop.f32.mrb[55].mxu1 }
 0x1ac   :  { %v3527_v29 = vadd.f32 %v3526_v27, %v3525_v17 }
 0x1ad   :  { %v4508_v30 = vadd.f32 %v3524_v16, %v1509_v24  ;;  %v1512_v31 = vadd.f32 %v3415_v26, %v4427_v38 }
 0x1af   :  { %v4511_v32 = vadd.f32 %v3527_v29, %v1512_v31  ;;  %v3416_v33 = vpop.f32.mrb[56].mxu0 }
 0x1b0   :  { %v3528_v34 = vpop.f32.mrb[56].mxu1  ;;  %v3417_v35 = vpop.f32.mrb[57].mxu0 }
 0x1b1   :  { %v3418_v36 = vadd.f32 %v3417_v35, %v3416_v33  ;;  %v3529_v37 = vpop.f32.mrb[57].mxu1  ;;  %v3419_v41 = vpop.f32.mrb[58].mxu0 }
 0x1b2   :  { %v3530_v45 = vadd.f32 %v3529_v37, %v3528_v34  ;;  %v3531_v49 = vpop.f32.mrb[58].mxu1  ;;  %v3420_v50 = vpop.f32.mrb[59].mxu0 }
 0x1b3   :  { %v1517_v51 = vadd.f32 %v3418_v36, %v4427_v38  ;;  %v3421_v52 = vadd.f32 %v3420_v50, %v3419_v41  ;;  %v3532_v53 = vpop.f32.mrb[59].mxu1 }
 0x1b4   :  { %v3533_v55 = vadd.f32 %v3532_v53, %v3531_v49 }
 0x1b5   :  { %v4514_v56 = vadd.f32 %v3530_v45, %v1517_v51  ;;  %v1520_v57 = vadd.f32 %v3421_v52, %v4427_v38 }
 0x1b7   :  { %v4517_v59 = vadd.f32 %v3533_v55, %v1520_v57  ;;  %v3422_v60 = vpop.f32.mrb[60].mxu0 }
 0x1b8   :  { %v3534_v62 = vpop.f32.mrb[60].mxu1  ;;  %v3423_v1 = vpop.f32.mrb[61].mxu0 }
 0x1b9   :  { %v3424_v4 = vadd.f32 %v3423_v1, %v3422_v60  ;;  %v3535_v7 = vpop.f32.mrb[61].mxu1  ;;  %v3425_v9 = vpop.f32.mrb[62].mxu0 }
 0x1ba   :  { %v3536_v10 = vadd.f32 %v3535_v7, %v3534_v62  ;;  %v3537_v11 = vpop.f32.mrb[62].mxu1  ;;  %v3426_v12 = vpop.f32.mrb[63].mxu0 }
 0x1bb   :  { %v1525_v13 = vadd.f32 %v3424_v4, %v4427_v38  ;;  %v3427_v15 = vadd.f32 %v3426_v12, %v3425_v9  ;;  %v3538_v16 = vpop.f32.mrb[63].mxu1 }
 0x1bc   :  { %v3539_v17 = vadd.f32 %v3538_v16, %v3537_v11 }
 0x1bd   :  { %v4520_v21 = vadd.f32 %v3536_v10, %v1525_v13  ;;  %v1528_v24 = vadd.f32 %v3427_v15, %v4427_v38 }
 0x1bf   :  { %v4523_v26 = vadd.f32 %v3539_v17, %v1528_v24  ;;  %v3556_v27 = vpop.f32.mrb[64].mxu0 }
 0x1c0   :  { %v3668_v29 = vpop.f32.mrb[64].mxu1  ;;  %v3557_v31 = vpop.f32.mrb[65].mxu0 }
 0x1c1   :  { %v3558_v33 = vadd.f32 %v3557_v31, %v3556_v27  ;;  %v3669_v34 = vpop.f32.mrb[65].mxu1  ;;  %v3559_v35 = vpop.f32.mrb[66].mxu0 }
 0x1c2   :  { %v3670_v36 = vadd.f32 %v3669_v34, %v3668_v29  ;;  %v3671_v37 = vpop.f32.mrb[66].mxu1  ;;  %v3560_v41 = vpop.f32.mrb[67].mxu0 }
 0x1c3   :  { %v1727_v45 = vadd.f32 %v3558_v33, %v4430_v54  ;;  %v3561_v49 = vadd.f32 %v3560_v41, %v3559_v35  ;;  %v3672_v50 = vpop.f32.mrb[67].mxu1 }
 0x1c4   :  { %v3673_v51 = vadd.f32 %v3672_v50, %v3671_v37 }
 0x1c5   :  { %v4526_v52 = vadd.f32 %v3670_v36, %v1727_v45  ;;  %v1730_v38 = vadd.f32 %v3561_v49, %v4433_v58 }
 0x1c7   :  { %v3266_v53 = vmul.f32 -1.442695, %v4526_v52  ;;  %v4530_v55 = vadd.f32 %v3673_v51, %v1730_v38  ;;  %v3562_v57 = vpop.f32.mrb[68].mxu0 }
 0x1c8   :  { %v3674_v60 = vpop.f32.mrb[68].mxu1  ;;  %v3563_v62 = vpop.f32.mrb[69].mxu0 }
 0x1c9   :  { %3999 = vpow2.f32 %v3266_v53  ;;  %v3267_v1 = vmul.f32 -1.442695, %v4530_v55  ;;  %v3564_v4 = vadd.f32 %v3563_v62, %v3562_v57  ;;  %v3675_v7 = vpop.f32.mrb[69].mxu1  ;;  %v3565_v54 = vpop.f32.mrb[70].mxu0 }
 0x1ca   :  { %v3676_v9 = vadd.f32 %v3675_v7, %v3674_v60  ;;  %v3677_v10 = vpop.f32.mrb[70].mxu1  ;;  %v3566_v11 = vpop.f32.mrb[71].mxu0 }
 0x1cb   :  { %4001 = vpow2.f32 %v3267_v1  ;;  %v1735_v12 = vadd.f32 %v3564_v4, %v4436_v14  ;;  %v3567_v58 = vadd.f32 %v3566_v11, %v3565_v54  ;;  %v3678_v13 = vpop.f32.mrb[71].mxu1 }
 0x1cc   :  { %v3679_v15 = vadd.f32 %v3678_v13, %v3677_v10 }
 0x1cd   :  { %v4534_v16 = vadd.f32 %v3676_v9, %v1735_v12  ;;  %v1738_v17 = vadd.f32 %v3567_v58, %v4439_v18 }
 0x1cf   :  { %v3268_v24 = vmul.f32 -1.442695, %v4534_v16  ;;  %v4538_v27 = vadd.f32 %v3679_v15, %v1738_v17  ;;  %v3568_v29 = vpop.f32.mrb[72].mxu0 }
 0x1d0   :  { %v3680_v31 = vpop.f32.mrb[72].mxu1  ;;  %v3569_v33 = vpop.f32.mrb[73].mxu0 }
 0x1d1   :  { %4003 = vpow2.f32 %v3268_v24  ;;  %v3269_v34 = vmul.f32 -1.442695, %v4538_v27  ;;  %v3570_v35 = vadd.f32 %v3569_v33, %v3568_v29  ;;  %v3681_v36 = vpop.f32.mrb[73].mxu1  ;;  %v3571_v14 = vpop.f32.mrb[74].mxu0 }
 0x1d2   :  { %v3682_v37 = vadd.f32 %v3681_v36, %v3680_v31  ;;  %v3683_v41 = vpop.f32.mrb[74].mxu1  ;;  %v3572_v45 = vpop.f32.mrb[75].mxu0 }
 0x1d3   :  { %v4000_v49 = vpop.eup %3999  ;;  %4005 = vpow2.f32 %v3269_v34  ;;  %v1743_v18 = vadd.f32 %v3570_v35, %v4442_v39  ;;  %v3573_v50 = vadd.f32 %v3572_v45, %v3571_v14  ;;  %v3684_v51 = vpop.f32.mrb[75].mxu1 }
 0x1d4   :  { %v2110_v38 = vadd.f32 1.0, %v4000_v49  ;;  %v3685_v53 = vadd.f32 %v3684_v51, %v3683_v41 }
 0x1d5   :  { %v4002_v57 = vpop.eup %4001  ;;  %v4542_v60 = vadd.f32 %v3682_v37, %v1743_v18  ;;  %v1746_v62 = vadd.f32 %v3573_v50, %v4445_v44  ;;  %v3991_v18 = vld [vmem:[#allocation8] sm:$0xff]   ;;  %v3992_v50 = vld [vmem:[#allocation8 + $0x8] sm:$0xff]  }
 0x1d6   :  { %4007 = vrcp.f32 %v2110_v38  ;;  %v2111_v1 = vadd.f32 1.0, %v4002_v57  ;;  %3860 = vmatprep.subr.bf16.mxu1 %v3991_v18 }
 0x1d7   :  { %v3270_v4 = vmul.f32 -1.442695, %v4542_v60  ;;  %v4546_v7 = vadd.f32 %v3685_v53, %v1746_v62  ;;  %v3574_v54 = vpop.f32.mrb[76].mxu0  ;;  %3861 = vmatpush3.bf16.msra.mxu1 %v3991_v18 }
 0x1d8   :  { %4009 = vrcp.f32 %v2111_v1  ;;  %v3686_v9 = vpop.f32.mrb[76].mxu1  ;;  %v3575_v10 = vpop.f32.mrb[77].mxu0  ;;  %3862 = vmatprep.subr.bf16.mxu1 %v3992_v50 }
 0x1d9   :  { %4011 = vpow2.f32 %v3270_v4  ;;  %v3271_v39 = vmul.f32 -1.442695, %v4546_v7  ;;  %v3576_v11 = vadd.f32 %v3575_v10, %v3574_v54  ;;  %v3687_v12 = vpop.f32.mrb[77].mxu1  ;;  %v3577_v58 = vpop.f32.mrb[78].mxu0 }
 0x1da   :  { %v3688_v13 = vadd.f32 %v3687_v12, %v3686_v9  ;;  %v3689_v15 = vpop.f32.mrb[78].mxu1  ;;  %v3578_v17 = vpop.f32.mrb[79].mxu0 }
 0x1db   :  { %v4004_v44 = vpop.eup %4003  ;;  %4013 = vpow2.f32 %v3271_v39  ;;  %v1751_v24 = vadd.f32 %v3576_v11, %v4448_v3  ;;  %v3579_v29 = vadd.f32 %v3578_v17, %v3577_v58  ;;  %v3690_v31 = vpop.f32.mrb[79].mxu1  ;;  %3863 = vmatpush3.bf16.msra.mxu1 %v3992_v50 }
 0x1dc   :  { %v2112_v33 = vadd.f32 1.0, %v4004_v44  ;;  %v3691_v34 = vadd.f32 %v3690_v31, %v3689_v15  ;;  %v3993_v15 = vld [vmem:[#allocation8 + $0x10] sm:$0xff]  }
 0x1dd   :  { %v4006_v35 = vpop.eup %4005  ;;  %v4550_v36 = vadd.f32 %v3688_v13, %v1751_v24  ;;  %v1754_v14 = vadd.f32 %v3579_v29, %v4451_v6  ;;  %3864 = vmatprep.subr.bf16.mxu1 %v3993_v15 }
 0x1de   :  { %4015 = vrcp.f32 %v2112_v33  ;;  %v2113_v37 = vadd.f32 1.0, %v4006_v35 }
 0x1df   :  { %v3272_v41 = vmul.f32 -1.442695, %v4550_v36  ;;  %v4554_v45 = vadd.f32 %v3691_v34, %v1754_v14  ;;  %v3580_v49 = vpop.f32.mrb[80].mxu0  ;;  %3865 = vmatpush3.bf16.msra.mxu1 %v3993_v15 }
 0x1e0   :  { %v4008_v51 = vpop.eup %4007  ;;  %4017 = vrcp.f32 %v2113_v37  ;;  %v3692_v3 = vpop.f32.mrb[80].mxu1 }
 0x1e1   :  { %v3581_v38 = vpop.f32.mrb[81].mxu0  ;;  %4019 = vpow2.f32 %v3272_v41  ;;  %v3273_v53 = vmul.f32 -1.442695, %v4554_v45  ;;  %v3693_v62 = vpop.f32.mrb[81].mxu1  ;;  %v2206_v4 = vmul.f32 %v4008_v51, %v4526_v52 }
 0x1e2   :  { %v3582_v57 = vadd.f32 %v3581_v38, %v3580_v49  ;;  %v3583_v1 = vpop.f32.mrb[82].mxu0  ;;  %v4010_v6 = vpop.eup %4009  ;;  %v3694_v54 = vadd.f32 %v3693_v62, %v3692_v3 }
 0x1e3   :  { %v3695_v9 = vpop.f32.mrb[82].mxu1  ;;  %v3584_v10 = vpop.f32.mrb[83].mxu0  ;;  %v2207_v11 = vmul.f32 %v4010_v6, %v4530_v55  ;;  %4021 = vpow2.f32 %v3273_v53 }
 0x1e4   :  { %v4012_v39 = vpop.eup %4011  ;;  %v1759_v12 = vadd.f32 %v3582_v57, %v4454_v25  ;;  %v3585_v58 = vadd.f32 %v3584_v10, %v3583_v1  ;;  %v3696_v13 = vpop.f32.mrb[83].mxu1 }
 0x1e5   :  { %v2114_v17 = vadd.f32 1.0, %v4012_v39  ;;  %v3697_v44 = vadd.f32 %v3696_v13, %v3695_v9  ;;  %v4014_v24 = vpop.eup %4013  ;;  %v2238_v31 = vpack.c.bf16 %v2207_v11, %v2206_v4 }
 0x1e6   :  { %v4560_v29 = vadd.f32 %v3694_v54, %v1759_v12  ;;  %v1762_v52 = vadd.f32 %v3585_v58, %v4457_v28  ;;  %v2115_v33 = vadd.f32 1.0, %v4014_v24 }
 0x1e7   :  { %4023 = vrcp.f32 %v2114_v17  ;;  %v3586_v25 = vpop.f32.mrb[84].mxu0  ;;  %3828 = vmatprep.mubr.bf16.mxu0 %v2238_v31 }
 0x1e8   :  { %v3274_v55 = vmul.f32 -1.442695, %v4560_v29  ;;  %v4564_v34 = vadd.f32 %v3697_v44, %v1762_v52  ;;  %v4016_v35 = vpop.eup %4015  ;;  %4025 = vrcp.f32 %v2115_v33  ;;  %v3698_v14 = vpop.f32.mrb[84].mxu1 }
 0x1e9   :  { %v3587_v37 = vpop.f32.mrb[85].mxu0  ;;  %v3699_v28 = vpop.f32.mrb[85].mxu1  ;;  %v2208_v50 = vmul.f32 %v4016_v35, %v4534_v16 }
 0x1ea   :  { %4027 = vpow2.f32 %v3274_v55  ;;  %v3275_v41 = vmul.f32 -1.442695, %v4564_v34  ;;  %v3588_v49 = vadd.f32 %v3587_v37, %v3586_v25  ;;  %v3589_v18 = vpop.f32.mrb[86].mxu0  ;;  %v4018_v51 = vpop.eup %4017  ;;  %v3700_v3 = vadd.f32 %v3699_v28, %v3698_v14 }
 0x1eb   :  { %v3701_v38 = vpop.f32.mrb[86].mxu1  ;;  %v3590_v53 = vpop.f32.mrb[87].mxu0  ;;  %v2209_v62 = vmul.f32 %v4018_v51, %v4538_v27 }
 0x1ec   :  { %v4020_v57 = vpop.eup %4019  ;;  %4029 = vpow2.f32 %v3275_v41  ;;  %v1767_v1 = vadd.f32 %v3588_v49, %v4460_v46  ;;  %v3591_v6 = vadd.f32 %v3590_v53, %v3589_v18  ;;  %v3702_v4 = vpop.f32.mrb[87].mxu1 }
 0x1ed   :  { %v2116_v54 = vadd.f32 1.0, %v4020_v57  ;;  %v3703_v9 = vadd.f32 %v3702_v4, %v3701_v38  ;;  %v4022_v10 = vpop.eup %4021  ;;  %v2239_v39 = vpack.c.bf16 %v2209_v62, %v2208_v50 }
 0x1ee   :  { %v4570_v11 = vadd.f32 %v3700_v3, %v1767_v1  ;;  %v1770_v16 = vadd.f32 %v3591_v6, %v4463_v48  ;;  %v2117_v12 = vadd.f32 1.0, %v4022_v10 }
 0x1ef   :  { %4031 = vrcp.f32 %v2116_v54  ;;  %v3592_v27 = vpop.f32.mrb[88].mxu0  ;;  %3829 = vmatmul.mubr.bf16.vlgmr.msra.gmra.mrb[128].mxu0 %v2239_v39 }
 0x1f0   :  { %v3276_v58 = vmul.f32 -1.442695, %v4570_v11  ;;  %v4574_v13 = vadd.f32 %v3703_v9, %v1770_v16  ;;  %4033 = vrcp.f32 %v2117_v12  ;;  %v3704_v46 = vpop.f32.mrb[88].mxu1  ;;  %v3593_v17 = vpop.f32.mrb[89].mxu0 }
 0x1f1   :  { %v4024_v15 = vpop.eup %4023  ;;  %v3594_v24 = vadd.f32 %v3593_v17, %v3592_v27  ;;  %v3705_v52 = vpop.f32.mrb[89].mxu1 }
 0x1f2   :  { %4035 = vpow2.f32 %v3276_v58  ;;  %v3277_v44 = vmul.f32 -1.442695, %v4574_v13  ;;  %v3595_v31 = vpop.f32.mrb[90].mxu0  ;;  %v4026_v33 = vpop.eup %4025  ;;  %v2210_v48 = vmul.f32 %v4024_v15, %v4542_v60  ;;  %v3706_v55 = vadd.f32 %v3705_v52, %v3704_v46 }
 0x1f3   :  { %v3707_v25 = vpop.f32.mrb[90].mxu1  ;;  %v3596_v35 = vpop.f32.mrb[91].mxu0  ;;  %v2211_v37 = vmul.f32 %v4026_v33, %v4546_v7  ;;  %v1775_v41 = vadd.f32 %v3594_v24, %v4466_v0 }
 0x1f4   :  { %v4028_v14 = vpop.eup %4027  ;;  %4037 = vpow2.f32 %v3277_v44  ;;  %v3597_v49 = vadd.f32 %v3596_v35, %v3595_v31  ;;  %v3708_v28 = vpop.f32.mrb[91].mxu1 }
 0x1f5   :  { %v2118_v18 = vadd.f32 1.0, %v4028_v14  ;;  %v3709_v51 = vadd.f32 %v3708_v28, %v3707_v25  ;;  %v4580_v3 = vadd.f32 %v3706_v55, %v1775_v41  ;;  %v2240_v53 = vpack.c.bf16 %v2211_v37, %v2210_v48 }
 0x1f6   :  { %v4030_v50 = vpop.eup %4029  ;;  %v1778_v38 = vadd.f32 %v3597_v49, %v4469_v2 }
 0x1f7   :  { %4039 = vrcp.f32 %v2118_v18  ;;  %v2119_v60 = vadd.f32 1.0, %v4030_v50  ;;  %v3278_v57 = vmul.f32 -1.442695, %v4580_v3  ;;  %v3598_v7 = vpop.f32.mrb[92].mxu0  ;;  %3832 = vmatprep.mubr.bf16.mxu0 %v2240_v53 }
 0x1f8   :  { %v4584_v62 = vadd.f32 %v3709_v51, %v1778_v38  ;;  %v3710_v0 = vpop.f32.mrb[92].mxu1  ;;  %v3599_v6 = vpop.f32.mrb[93].mxu0 }
 0x1f9   :  { %v4032_v1 = vpop.eup %4031  ;;  %4041 = vrcp.f32 %v2119_v60  ;;  %v3600_v54 = vadd.f32 %v3599_v6, %v3598_v7  ;;  %v3711_v9 = vpop.f32.mrb[93].mxu1 }
 0x1fa   :  { %4043 = vpow2.f32 %v3278_v57  ;;  %v3279_v4 = vmul.f32 -1.442695, %v4584_v62  ;;  %v3601_v10 = vpop.f32.mrb[94].mxu0  ;;  %v4034_v2 = vpop.eup %4033  ;;  %v2212_v39 = vmul.f32 %v4032_v1, %v4550_v36  ;;  %v3712_v16 = vadd.f32 %v3711_v9, %v3710_v0 }
 0x1fb   :  { %v3713_v12 = vpop.f32.mrb[94].mxu1  ;;  %v3602_v58 = vpop.f32.mrb[95].mxu0  ;;  %v2213_v15 = vmul.f32 %v4034_v2, %v4554_v45  ;;  %v1783_v46 = vadd.f32 %v3600_v54, %v4472_v20 }
 0x1fc   :  { %v4036_v27 = vpop.eup %4035  ;;  %4045 = vpow2.f32 %v3279_v4  ;;  %v3603_v17 = vadd.f32 %v3602_v58, %v3601_v10  ;;  %v3714_v44 = vpop.f32.mrb[95].mxu1 }
 0x1fd   :  { %v2120_v24 = vadd.f32 1.0, %v4036_v27  ;;  %v3715_v52 = vadd.f32 %v3714_v44, %v3713_v12  ;;  %v4590_v33 = vadd.f32 %v3712_v16, %v1783_v46  ;;  %v2241_v55 = vpack.c.bf16 %v2213_v15, %v2212_v39 }
 0x1fe   :  { %v4038_v31 = vpop.eup %4037  ;;  %v1786_v48 = vadd.f32 %v3603_v17, %v4475_v22 }
 0x1ff   :  { %4047 = vrcp.f32 %v2120_v24  ;;  %v2121_v36 = vadd.f32 1.0, %v4038_v31  ;;  %v3280_v25 = vmul.f32 -1.442695, %v4590_v33  ;;  %v3604_v45 = vpop.f32.mrb[96].mxu0  ;;  %3833 = vmatmul.mubr.bf16.gmra.mrb[132].mxu0 %v2241_v55 }
 0x200   :  { %v4594_v35 = vadd.f32 %v3715_v52, %v1786_v48  ;;  %v3716_v20 = vpop.f32.mrb[96].mxu1  ;;  %v3605_v37 = vpop.f32.mrb[97].mxu0 }
 0x201   :  { %v4040_v14 = vpop.eup %4039  ;;  %4049 = vrcp.f32 %v2121_v36  ;;  %v3606_v49 = vadd.f32 %v3605_v37, %v3604_v45  ;;  %v3717_v28 = vpop.f32.mrb[97].mxu1 }
 0x202   :  { %4051 = vpow2.f32 %v3280_v25  ;;  %v3281_v41 = vmul.f32 -1.442695, %v4594_v35  ;;  %v3607_v18 = vpop.f32.mrb[98].mxu0  ;;  %v2214_v51 = vmul.f32 %v4040_v14, %v4560_v29  ;;  %v3718_v50 = vadd.f32 %v3717_v28, %v3716_v20  ;;  %v3719_v38 = vpop.f32.mrb[98].mxu1 }
 0x203   :  { %v4042_v22 = vpop.eup %4041  ;;  %v3608_v53 = vpop.f32.mrb[99].mxu0  ;;  %v1791_v7 = vadd.f32 %v3606_v49, %v4478_v40 }
 0x204   :  { %v4044_v60 = vpop.eup %4043  ;;  %v2215_v57 = vmul.f32 %v4042_v22, %v4564_v34  ;;  %4053 = vpow2.f32 %v3281_v41  ;;  %v3609_v1 = vadd.f32 %v3608_v53, %v3607_v18  ;;  %v3720_v0 = vpop.f32.mrb[99].mxu1 }
 0x205   :  { %v2122_v6 = vadd.f32 1.0, %v4044_v60  ;;  %v3721_v4 = vadd.f32 %v3720_v0, %v3719_v38  ;;  %v4600_v9 = vadd.f32 %v3718_v50, %v1791_v7 }
 0x206   :  { %v4046_v54 = vpop.eup %4045  ;;  %v1794_v10 = vadd.f32 %v3609_v1, %v4481_v42  ;;  %v2242_v2 = vpack.c.bf16 %v2215_v57, %v2214_v51 }
 0x207   :  { %4055 = vrcp.f32 %v2122_v6  ;;  %v2123_v29 = vadd.f32 1.0, %v4046_v54  ;;  %v3282_v39 = vmul.f32 -1.442695, %v4600_v9  ;;  %v3610_v34 = vpop.f32.mrb[100].mxu0 }
 0x208   :  { %v4604_v16 = vadd.f32 %v3721_v4, %v1794_v10  ;;  %3836 = vmatprep.mubr.bf16.mxu0 %v2242_v2  ;;  %v3722_v40 = vpop.f32.mrb[100].mxu1  ;;  %v3611_v58 = vpop.f32.mrb[101].mxu0 }
 0x209   :  { %v4048_v12 = vpop.eup %4047  ;;  %4057 = vrcp.f32 %v2123_v29  ;;  %v3612_v15 = vadd.f32 %v3611_v58, %v3610_v34  ;;  %v3723_v46 = vpop.f32.mrb[101].mxu1 }
 0x20a   :  { %4059 = vpow2.f32 %v3282_v39  ;;  %v3283_v27 = vmul.f32 -1.442695, %v4604_v16  ;;  %v3613_v17 = vpop.f32.mrb[102].mxu0  ;;  %v2216_v44 = vmul.f32 %v4048_v12, %v4570_v11  ;;  %v3724_v24 = vadd.f32 %v3723_v46, %v3722_v40  ;;  %v3725_v52 = vpop.f32.mrb[102].mxu1 }
 0x20b   :  { %v4050_v42 = vpop.eup %4049  ;;  %v3614_v31 = vpop.f32.mrb[103].mxu0  ;;  %v1799_v36 = vadd.f32 %v3612_v15, %v4484_v61 }
 0x20c   :  { %v4052_v48 = vpop.eup %4051  ;;  %v2217_v55 = vmul.f32 %v4050_v42, %v4574_v13  ;;  %4061 = vpow2.f32 %v3283_v27  ;;  %v3615_v25 = vadd.f32 %v3614_v31, %v3613_v17  ;;  %v3726_v45 = vpop.f32.mrb[103].mxu1 }
 0x20d   :  { %v2124_v14 = vadd.f32 1.0, %v4052_v48  ;;  %v3727_v20 = vadd.f32 %v3726_v45, %v3725_v52  ;;  %v4610_v41 = vadd.f32 %v3724_v24, %v1799_v36 }
 0x20e   :  { %v4054_v37 = vpop.eup %4053  ;;  %v1802_v49 = vadd.f32 %v3615_v25, %v4487_v63  ;;  %v2243_v28 = vpack.c.bf16 %v2217_v55, %v2216_v44 }
 0x20f   :  { %4063 = vrcp.f32 %v2124_v14  ;;  %v2125_v11 = vadd.f32 1.0, %v4054_v37  ;;  %v3284_v18 = vmul.f32 -1.442695, %v4610_v41  ;;  %v3616_v13 = vpop.f32.mrb[104].mxu0 }
 0x210   :  { %v4614_v22 = vadd.f32 %v3727_v20, %v1802_v49  ;;  %3837 = vmatmul.mubr.bf16.gmra.mrb[136].mxu0 %v2243_v28  ;;  %v3728_v61 = vpop.f32.mrb[104].mxu1  ;;  %v3617_v50 = vpop.f32.mrb[105].mxu0 }
 0x211   :  { %v4056_v51 = vpop.eup %4055  ;;  %4065 = vrcp.f32 %v2125_v11  ;;  %v3618_v53 = vadd.f32 %v3617_v50, %v3616_v13  ;;  %v3729_v60 = vpop.f32.mrb[105].mxu1 }
 0x212   :  { %4067 = vpow2.f32 %v3284_v18  ;;  %v3285_v38 = vmul.f32 -1.442695, %v4614_v22  ;;  %v3619_v57 = vpop.f32.mrb[106].mxu0  ;;  %v2218_v7 = vmul.f32 %v4056_v51, %v4580_v3  ;;  %v3730_v1 = vadd.f32 %v3729_v60, %v3728_v61  ;;  %v3731_v0 = vpop.f32.mrb[106].mxu1 }
 0x213   :  { %v4058_v63 = vpop.eup %4057  ;;  %v3620_v6 = vpop.f32.mrb[107].mxu0  ;;  %v1807_v10 = vadd.f32 %v3618_v53, %v4490_v19 }
 0x214   :  { %v4060_v4 = vpop.eup %4059  ;;  %v2219_v54 = vmul.f32 %v4058_v63, %v4584_v62  ;;  %4069 = vpow2.f32 %v3285_v38  ;;  %v3621_v2 = vadd.f32 %v3620_v6, %v3619_v57  ;;  %v3732_v29 = vpop.f32.mrb[107].mxu1 }
 0x215   :  { %v2126_v39 = vadd.f32 1.0, %v4060_v4  ;;  %v3733_v34 = vadd.f32 %v3732_v29, %v3731_v0  ;;  %v4620_v40 = vadd.f32 %v3730_v1, %v1807_v10 }
 0x216   :  { %v4062_v12 = vpop.eup %4061  ;;  %v1810_v58 = vadd.f32 %v3621_v2, %v4493_v23  ;;  %v2244_v27 = vpack.c.bf16 %v2219_v54, %v2218_v7 }
 0x217   :  { %4071 = vrcp.f32 %v2126_v39  ;;  %v2127_v3 = vadd.f32 1.0, %v4062_v12  ;;  %v3286_v15 = vmul.f32 -1.442695, %v4620_v40  ;;  %v3622_v62 = vpop.f32.mrb[108].mxu0 }
 0x218   :  { %v4624_v46 = vadd.f32 %v3733_v34, %v1810_v58  ;;  %3840 = vmatprep.mubr.bf16.mxu0 %v2244_v27  ;;  %v3734_v19 = vpop.f32.mrb[108].mxu1  ;;  %v3623_v42 = vpop.f32.mrb[109].mxu0 }
 0x219   :  { %v4064_v17 = vpop.eup %4063  ;;  %4073 = vrcp.f32 %v2127_v3  ;;  %v3624_v24 = vadd.f32 %v3623_v42, %v3622_v62  ;;  %v3735_v52 = vpop.f32.mrb[109].mxu1 }
 0x21a   :  { %4075 = vpow2.f32 %v3286_v15  ;;  %v3287_v44 = vmul.f32 -1.442695, %v4624_v46  ;;  %v3625_v31 = vpop.f32.mrb[110].mxu0  ;;  %v2220_v48 = vmul.f32 %v4064_v17, %v4590_v33  ;;  %v3736_v55 = vadd.f32 %v3735_v52, %v3734_v19  ;;  %v3737_v36 = vpop.f32.mrb[110].mxu1 }
 0x21b   :  { %v4066_v23 = vpop.eup %4065  ;;  %v3626_v25 = vpop.f32.mrb[111].mxu0  ;;  %v1815_v20 = vadd.f32 %v3624_v24, %v4496_v43 }
 0x21c   :  { %v4068_v45 = vpop.eup %4067  ;;  %v2221_v14 = vmul.f32 %v4066_v23, %v4594_v35  ;;  %4077 = vpow2.f32 %v3287_v44  ;;  %v3627_v37 = vadd.f32 %v3626_v25, %v3625_v31  ;;  %v3738_v49 = vpop.f32.mrb[111].mxu1 }
 0x21d   :  { %v2128_v28 = vadd.f32 1.0, %v4068_v45  ;;  %v3739_v11 = vadd.f32 %v3738_v49, %v3737_v36  ;;  %v4630_v13 = vadd.f32 %v3736_v55, %v1815_v20 }
 0x21e   :  { %v4070_v18 = vpop.eup %4069  ;;  %v1818_v51 = vadd.f32 %v3627_v37, %v4499_v47  ;;  %v2245_v61 = vpack.c.bf16 %v2221_v14, %v2220_v48 }
 0x21f   :  { %4079 = vrcp.f32 %v2128_v28  ;;  %v2129_v33 = vadd.f32 1.0, %v4070_v18  ;;  %v3288_v50 = vmul.f32 -1.442695, %v4630_v13  ;;  %v3628_v35 = vpop.f32.mrb[112].mxu0 }
 0x220   :  { %v4634_v38 = vadd.f32 %v3739_v11, %v1818_v51  ;;  %3841 = vmatmul.mubr.bf16.gmra.mrb[140].mxu0 %v2245_v61  ;;  %v3740_v43 = vpop.f32.mrb[112].mxu1  ;;  %v3629_v60 = vpop.f32.mrb[113].mxu0 }
 0x221   :  { %v4072_v53 = vpop.eup %4071  ;;  %4081 = vrcp.f32 %v2129_v33  ;;  %v3630_v63 = vadd.f32 %v3629_v60, %v3628_v35  ;;  %v3741_v7 = vpop.f32.mrb[113].mxu1 }
 0x222   :  { %4083 = vpow2.f32 %v3288_v50  ;;  %v3289_v57 = vmul.f32 -1.442695, %v4634_v38  ;;  %v3631_v1 = vpop.f32.mrb[114].mxu0  ;;  %v2222_v0 = vmul.f32 %v4072_v53, %v4600_v9  ;;  %v3742_v6 = vadd.f32 %v3741_v7, %v3740_v43  ;;  %v3743_v4 = vpop.f32.mrb[114].mxu1 }
 0x223   :  { %v4074_v47 = vpop.eup %4073  ;;  %v3632_v54 = vpop.f32.mrb[115].mxu0  ;;  %v1823_v29 = vadd.f32 %v3630_v63, %v4502_v5 }
 0x224   :  { %v4076_v10 = vpop.eup %4075  ;;  %v2223_v2 = vmul.f32 %v4074_v47, %v4604_v16  ;;  %4085 = vpow2.f32 %v3289_v57  ;;  %v3633_v39 = vadd.f32 %v3632_v54, %v3631_v1  ;;  %v3744_v34 = vpop.f32.mrb[115].mxu1 }
 0x225   :  { %v2130_v12 = vadd.f32 1.0, %v4076_v10  ;;  %v3745_v58 = vadd.f32 %v3744_v34, %v3743_v4  ;;  %v4640_v3 = vadd.f32 %v3742_v6, %v1823_v29 }
 0x226   :  { %v4078_v27 = vpop.eup %4077  ;;  %v1826_v15 = vadd.f32 %v3633_v39, %v4505_v8  ;;  %v2246_v62 = vpack.c.bf16 %v2223_v2, %v2222_v0 }
 0x227   :  { %4087 = vrcp.f32 %v2130_v12  ;;  %v2131_v9 = vadd.f32 1.0, %v4078_v27  ;;  %v3290_v17 = vmul.f32 -1.442695, %v4640_v3  ;;  %v3634_v16 = vpop.f32.mrb[116].mxu0 }
 0x228   :  { %v4644_v19 = vadd.f32 %v3745_v58, %v1826_v15  ;;  %3844 = vmatprep.mubr.bf16.mxu0 %v2246_v62  ;;  %v3746_v5 = vpop.f32.mrb[116].mxu1  ;;  %v3635_v44 = vpop.f32.mrb[117].mxu0 }
 0x229   :  { %v4080_v42 = vpop.eup %4079  ;;  %4089 = vrcp.f32 %v2131_v9  ;;  %v3636_v52 = vadd.f32 %v3635_v44, %v3634_v16  ;;  %v3747_v31 = vpop.f32.mrb[117].mxu1 }
 0x22a   :  { %4091 = vpow2.f32 %v3290_v17  ;;  %v3291_v24 = vmul.f32 -1.442695, %v4644_v19  ;;  %v3637_v23 = vpop.f32.mrb[118].mxu0  ;;  %v2224_v48 = vmul.f32 %v4080_v42, %v4610_v41  ;;  %v3748_v55 = vadd.f32 %v3747_v31, %v3746_v5  ;;  %v3749_v36 = vpop.f32.mrb[118].mxu1 }
 0x22b   :  { %v4082_v8 = vpop.eup %4081  ;;  %v3638_v25 = vpop.f32.mrb[119].mxu0  ;;  %v1831_v20 = vadd.f32 %v3636_v52, %v4508_v30 }
 0x22c   :  { %v4084_v45 = vpop.eup %4083  ;;  %v2225_v14 = vmul.f32 %v4082_v8, %v4614_v22  ;;  %4093 = vpow2.f32 %v3291_v24  ;;  %v3639_v37 = vadd.f32 %v3638_v25, %v3637_v23  ;;  %v3750_v49 = vpop.f32.mrb[119].mxu1 }
 0x22d   :  { %v2132_v28 = vadd.f32 1.0, %v4084_v45  ;;  %v3751_v11 = vadd.f32 %v3750_v49, %v3749_v36  ;;  %v4650_v51 = vadd.f32 %v3748_v55, %v1831_v20 }
 0x22e   :  { %v4086_v18 = vpop.eup %4085  ;;  %v1834_v61 = vadd.f32 %v3639_v37, %v4511_v32  ;;  %v2247_v33 = vpack.c.bf16 %v2225_v14, %v2224_v48 }
 0x22f   :  { %4095 = vrcp.f32 %v2132_v28  ;;  %v2133_v41 = vadd.f32 1.0, %v4086_v18  ;;  %v3292_v50 = vmul.f32 -1.442695, %v4650_v51  ;;  %v3640_v22 = vpop.f32.mrb[120].mxu0 }
 0x230   :  { %v4654_v35 = vadd.f32 %v3751_v11, %v1834_v61  ;;  %3845 = vmatmul.mubr.bf16.gmra.mrb[144].mxu0 %v2247_v33  ;;  %v3752_v30 = vpop.f32.mrb[120].mxu1  ;;  %v3641_v43 = vpop.f32.mrb[121].mxu0 }
 0x231   :  { %v4088_v53 = vpop.eup %4087  ;;  %4097 = vrcp.f32 %v2133_v41  ;;  %v3642_v57 = vadd.f32 %v3641_v43, %v3640_v22  ;;  %v3753_v63 = vpop.f32.mrb[121].mxu1 }
 0x232   :  { %4099 = vpow2.f32 %v3292_v50  ;;  %v3293_v60 = vmul.f32 -1.442695, %v4654_v35  ;;  %v3643_v7 = vpop.f32.mrb[122].mxu0  ;;  %v2226_v1 = vmul.f32 %v4088_v53, %v4620_v40  ;;  %v3754_v47 = vadd.f32 %v3753_v63, %v3752_v30  ;;  %v3755_v0 = vpop.f32.mrb[122].mxu1 }
 0x233   :  { %v4090_v32 = vpop.eup %4089  ;;  %v3644_v6 = vpop.f32.mrb[123].mxu0  ;;  %v1839_v10 = vadd.f32 %v3642_v57, %v4514_v56 }
 0x234   :  { %v4092_v4 = vpop.eup %4091  ;;  %v2227_v54 = vmul.f32 %v4090_v32, %v4624_v46  ;;  %4101 = vpow2.f32 %v3293_v60  ;;  %v3645_v2 = vadd.f32 %v3644_v6, %v3643_v7  ;;  %v3756_v29 = vpop.f32.mrb[123].mxu1  ;;  %v3994_v6 = vld [vmem:[#allocation8 + $0x18] sm:$0xff]  }
 0x235   :  { %v2134_v39 = vadd.f32 1.0, %v4092_v4  ;;  %v3757_v34 = vadd.f32 %v3756_v29, %v3755_v0  ;;  %v4660_v58 = vadd.f32 %v3754_v47, %v1839_v10  ;;  %3866 = vmatprep.subr.bf16.mxu1 %v3994_v6  ;;  %v3996_v29 = vld [vmem:[#allocation8 + $0x28] sm:$0xff]  }
 0x236   :  { %v4094_v12 = vpop.eup %4093  ;;  %v1842_v27 = vadd.f32 %v3645_v2, %v4517_v59  ;;  %v2248_v15 = vpack.c.bf16 %v2227_v54, %v2226_v1  ;;  %3867 = vmatpush3.bf16.msra.mxu1 %v3994_v6 }
 0x237   :  { %4103 = vrcp.f32 %v2134_v39  ;;  %v2135_v40 = vadd.f32 1.0, %v4094_v12  ;;  %v3294_v62 = vmul.f32 -1.442695, %v4660_v58  ;;  %v3646_v46 = vpop.f32.mrb[124].mxu0 }
 0x238   :  { %v4664_v9 = vadd.f32 %v3757_v34, %v1842_v27  ;;  %3848 = vmatprep.mubr.bf16.mxu0 %v2248_v15  ;;  %v3758_v56 = vpop.f32.mrb[124].mxu1  ;;  %v3647_v16 = vpop.f32.mrb[125].mxu0  ;;  %v3997_v15 = vld [vmem:[#allocation8 + $0x30] sm:$0xff]  }
 0x239   :  { %v4096_v17 = vpop.eup %4095  ;;  %4105 = vrcp.f32 %v2135_v40  ;;  %v3648_v5 = vadd.f32 %v3647_v16, %v3646_v46  ;;  %v3759_v44 = vpop.f32.mrb[125].mxu1  ;;  %v4680_v40 = vld [vmem:[%s4977_s4] ss:$0 sm:$0xff] }
 0x23a   :  { %4107 = vpow2.f32 %v3294_v62  ;;  %v3295_v42 = vmul.f32 -1.442695, %v4664_v9  ;;  %v3649_v24 = vpop.f32.mrb[126].mxu0  ;;  %v2228_v52 = vmul.f32 %v4096_v17, %v4630_v13  ;;  %v3760_v31 = vadd.f32 %v3759_v44, %v3758_v56  ;;  %v3761_v23 = vpop.f32.mrb[126].mxu1 }
 0x23b   :  { %v4098_v59 = vpop.eup %4097  ;;  %v3650_v8 = vpop.f32.mrb[127].mxu0  ;;  %v1847_v36 = vadd.f32 %v3648_v5, %v4520_v21 }
 0x23c   :  { %v4100_v48 = vpop.eup %4099  ;;  %v2229_v55 = vmul.f32 %v4098_v59, %v4634_v38  ;;  %4109 = vpow2.f32 %v3295_v42  ;;  %v3651_v25 = vadd.f32 %v3650_v8, %v3649_v24  ;;  %v3762_v45 = vpop.f32.mrb[127].mxu1 }
 0x23d   :  { %v2136_v14 = vadd.f32 1.0, %v4100_v48  ;;  %v3763_v20 = vadd.f32 %v3762_v45, %v3761_v23  ;;  %v2008_v49 = vadd.f32 %v3760_v31, %v1847_v36 }
 0x23e   :  { %v4102_v37 = vpop.eup %4101  ;;  %v1850_v28 = vadd.f32 %v3651_v25, %v4523_v26  ;;  %v2249_v11 = vpack.c.bf16 %v2229_v55, %v2228_v52 }
 0x23f   :  { %4111 = vrcp.f32 %v2136_v14  ;;  %v2137_v13 = vadd.f32 1.0, %v4102_v37  ;;  %v3296_v18 = vmul.f32 -1.442695, %v2008_v49 }
 0x240   :  { %v2011_v61 = vadd.f32 %v3763_v20, %v1850_v28  ;;  %3849 = vmatmul.mubr.bf16.gmra.mrb[148].mxu0 %v2249_v11 }
 0x241   :  { %v4104_v33 = vpop.eup %4103  ;;  %4113 = vrcp.f32 %v2137_v13 }
 0x242   :  { %4115 = vpow2.f32 %v3296_v18  ;;  %v3297_v38 = vmul.f32 -1.442695, %v2011_v61  ;;  %v2230_v50 = vmul.f32 %v4104_v33, %v4640_v3 }
 0x243   :  { %v4106_v41 = vpop.eup %4105 }
 0x244   :  { %v4108_v21 = vpop.eup %4107  ;;  %v2231_v22 = vmul.f32 %v4106_v41, %v4644_v19  ;;  %4117 = vpow2.f32 %v3297_v38 }
 0x245   :  { %v2138_v53 = vadd.f32 1.0, %v4108_v21 }
 0x246   :  { %v4110_v30 = vpop.eup %4109  ;;  %v2250_v26 = vpack.c.bf16 %v2231_v22, %v2230_v50 }
 0x247   :  { %4119 = vrcp.f32 %v2138_v53  ;;  %v2139_v43 = vadd.f32 1.0, %v4110_v30 }
 0x248   :  { %3852 = vmatprep.mubr.bf16.mxu0 %v2250_v26 }
 0x249   :  { %v4112_v60 = vpop.eup %4111  ;;  %4121 = vrcp.f32 %v2139_v43 }
 0x24a   :  { %v2232_v7 = vmul.f32 %v4112_v60, %v4650_v51  ;;  %v3995_v51 = vld [vmem:[#allocation8 + $0x20] sm:$0xff]  }
 0x24b   :  { %v4114_v57 = vpop.eup %4113  ;;  %3868 = vmatprep.subr.bf16.mxu1 %v3995_v51 }
 0x24c   :  { %v4116_v63 = vpop.eup %4115  ;;  %v2233_v32 = vmul.f32 %v4114_v57, %v4654_v35  ;;  %3869 = vmatpush3.bf16.msra.mxu1 %v3995_v51 }
 0x24d   :  { %v2140_v1 = vadd.f32 1.0, %v4116_v63  ;;  %3870 = vmatprep.subr.bf16.mxu1 %v3996_v29 }
 0x24e   :  { %v4118_v47 = vpop.eup %4117  ;;  %v2251_v3 = vpack.c.bf16 %v2233_v32, %v2232_v7 }
 0x24f   :  { %4123 = vrcp.f32 %v2140_v1  ;;  %v2141_v19 = vadd.f32 1.0, %v4118_v47 }
 0x250   :  { %3853 = vmatmul.mubr.bf16.gmra.mrb[152].mxu0 %v2251_v3  ;;  %3871 = vmatpush3.bf16.msra.mxu1 %v3996_v29 }
 0x251   :  { %v4120_v0 = vpop.eup %4119  ;;  %4125 = vrcp.f32 %v2141_v19  ;;  %3872 = vmatprep.subr.bf16.mxu1 %v3997_v15 }
 0x252   :  { %v2234_v54 = vmul.f32 %v4120_v0, %v4660_v58  ;;  %v3998_v58 = vld [vmem:[#allocation8 + $0x38] sm:$0xff]  }
 0x253   :  { %v4122_v4 = vpop.eup %4121 }
 0x254   :  { %v2235_v10 = vmul.f32 %v4122_v4, %v4664_v9  ;;  %3873 = vmatpush3.bf16.msra.mxu1 %v3997_v15 }
 0x255   :  { %3874 = vmatprep.subr.bf16.mxu1 %v3998_v58 }
 0x256   :  { %v2252_v2 = vpack.c.bf16 %v2235_v10, %v2234_v54 }
 0x258   :  { %3856 = vmatprep.mubr.bf16.mxu0 %v2252_v2  ;;  %3875 = vmatpush3.bf16.msra.mxu1 %v3998_v58 }
 0x259   :  { %v4124_v35 = vpop.eup %4123 }
 0x25a   :  { %v2236_v34 = vmul.f32 %v4124_v35, %v2008_v49 }
 0x25b   :  { %v4126_v39 = vpop.eup %4125 }
 0x25c   :  { %v2237_v12 = vmul.f32 %v4126_v39, %v2011_v61 }
 0x25e   :  { %v2253_v27 = vpack.c.bf16 %v2237_v12, %v2236_v34 }
 0x260   :  { %3857 = vmatmul.mubr.bf16.gmra.mrb[156].mxu0 %v2253_v27 }
 0x2c2   :  { %v3830_v62 = vpop.f32.mrb[128].mxu0 }
 0x2c3   :  { %v4683_v9 = vadd.f32 %v3830_v62, %v4680_v40  ;;  %v2359_v46 = vpop.f32.mrb[129].mxu0 }
 0x2c4   :  { %v4686_v17 = vadd.f32 %v4680_v40, %v2359_v46  ;;  %v3831_v56 = vpop.f32.mrb[130].mxu0 }
 0x2c5   :  { %v2488_v16 = vmul.f32 %v4683_v9, %v4683_v9  ;;  %v4691_v42 = vadd.f32 %v3831_v56, %v4680_v40  ;;  %v2362_v5 = vpop.f32.mrb[131].mxu0 }
 0x2c6   :  { %v2486_v44 = vmul.f32 %v4686_v17, %v4686_v17  ;;  %v4696_v24 = vadd.f32 %v4680_v40, %v2362_v5 }
 0x2c7   :  { %v2520_v59 = vmul.f32 %v2488_v16, %v4683_v9  ;;  %v2489_v52 = vmul.f32 %v4691_v42, %v4691_v42 }
 0x2c8   :  { %v2518_v31 = vmul.f32 %v2486_v44, %v4686_v17  ;;  %v2487_v23 = vmul.f32 %v4696_v24, %v4696_v24 }
 0x2c9   :  { %v2552_v8 = vmul.f32 0.044715, %v2520_v59  ;;  %v2521_v48 = vmul.f32 %v2489_v52, %v4691_v42 }
 0x2ca   :  { %v2550_v55 = vmul.f32 0.044715, %v2518_v31  ;;  %v2519_v36 = vmul.f32 %v2487_v23, %v4696_v24 }
 0x2cb   :  { %v2584_v25 = vadd.f32 %v2552_v8, %v4683_v9  ;;  %v2553_v45 = vmul.f32 0.044715, %v2521_v48 }
 0x2cc   :  { %v2582_v14 = vadd.f32 %v2550_v55, %v4686_v17  ;;  %v2551_v20 = vmul.f32 0.044715, %v2519_v36 }
 0x2cd   :  { %v2616_v37 = vmul.f32 0.7978846, %v2584_v25  ;;  %v2585_v49 = vadd.f32 %v2553_v45, %v4691_v42 }
 0x2ce   :  { %v2614_v28 = vmul.f32 0.7978846, %v2582_v14  ;;  %v2583_v11 = vadd.f32 %v2551_v20, %v4696_v24 }
 0x2cf   :  { %4127 = vtanh.f32 %v2616_v37  ;;  %v2617_v13 = vmul.f32 0.7978846, %v2585_v49 }
 0x2d0   :  { %4129 = vtanh.f32 %v2614_v28  ;;  %v2615_v18 = vmul.f32 0.7978846, %v2583_v11 }
 0x2d1   :  { %4131 = vtanh.f32 %v2617_v13 }
 0x2d2   :  { %4133 = vtanh.f32 %v2615_v18  ;;  %v3834_v61 = vpop.f32.mrb[132].mxu0 }
 0x2d3   :  { %v4711_v33 = vadd.f32 %v3834_v61, %v4680_v40  ;;  %v2375_v38 = vpop.f32.mrb[133].mxu0 }
 0x2d4   :  { %v4714_v41 = vadd.f32 %v4680_v40, %v2375_v38  ;;  %v3835_v21 = vpop.f32.mrb[134].mxu0 }
 0x2d5   :  { %v2492_v50 = vmul.f32 %v4711_v33, %v4711_v33  ;;  %v4719_v22 = vadd.f32 %v3835_v21, %v4680_v40  ;;  %v2378_v53 = vpop.f32.mrb[135].mxu0 }
 0x2d6   :  { %v2490_v30 = vmul.f32 %v4714_v41, %v4714_v41  ;;  %v4724_v26 = vadd.f32 %v4680_v40, %v2378_v53 }
 0x2d7   :  { %v2524_v43 = vmul.f32 %v2492_v50, %v4711_v33  ;;  %v2493_v60 = vmul.f32 %v4719_v22, %v4719_v22 }
 0x2d8   :  { %v2522_v57 = vmul.f32 %v2490_v30, %v4714_v41  ;;  %v2491_v63 = vmul.f32 %v4724_v26, %v4724_v26 }
 0x2d9   :  { %v4128_v7 = vpop.eup %4127  ;;  %v2556_v32 = vmul.f32 0.044715, %v2524_v43  ;;  %v2525_v1 = vmul.f32 %v2493_v60, %v4719_v22 }
 0x2da   :  { %v4130_v47 = vpop.eup %4129  ;;  %v2680_v3 = vadd.f32 1.0, %v4128_v7  ;;  %v2554_v19 = vmul.f32 0.044715, %v2522_v57  ;;  %v2523_v0 = vmul.f32 %v2491_v63, %v4724_v26 }
 0x2db   :  { %v4132_v6 = vpop.eup %4131  ;;  %v2588_v4 = vadd.f32 %v2556_v32, %v4711_v33  ;;  %v2557_v54 = vmul.f32 0.044715, %v2525_v1  ;;  %v2678_v10 = vadd.f32 1.0, %v4130_v47 }
 0x2dc   :  { %v4134_v2 = vpop.eup %4133  ;;  %v2712_v51 = vmul.f32 0.5, %v2680_v3  ;;  %v2681_v35 = vadd.f32 1.0, %v4132_v6  ;;  %v2586_v29 = vadd.f32 %v2554_v19, %v4714_v41  ;;  %v2555_v39 = vmul.f32 0.044715, %v2523_v0 }
 0x2dd   :  { %v2620_v34 = vmul.f32 0.7978846, %v2588_v4  ;;  %v2589_v12 = vadd.f32 %v2557_v54, %v4719_v22  ;;  %v2679_v27 = vadd.f32 1.0, %v4134_v2  ;;  %v2710_v15 = vmul.f32 0.5, %v2678_v10 }
 0x2de   :  { %v2713_v58 = vmul.f32 0.5, %v2681_v35  ;;  %v2618_v62 = vmul.f32 0.7978846, %v2586_v29  ;;  %v2587_v46 = vadd.f32 %v2555_v39, %v4724_v26  ;;  %v2744_v5 = vmul.f32 %v2712_v51, %v4683_v9 }
 0x2df   :  { %4135 = vtanh.f32 %v2620_v34  ;;  %v2621_v56 = vmul.f32 0.7978846, %v2589_v12  ;;  %v2711_v16 = vmul.f32 0.5, %v2679_v27  ;;  %v2742_v52 = vmul.f32 %v2710_v15, %v4686_v17 }
 0x2e0   :  { %v2745_v44 = vmul.f32 %v2713_v58, %v4691_v42  ;;  %4137 = vtanh.f32 %v2618_v62  ;;  %v2619_v59 = vmul.f32 0.7978846, %v2587_v46 }
 0x2e1   :  { %4139 = vtanh.f32 %v2621_v56  ;;  %v2743_v31 = vmul.f32 %v2711_v16, %v4696_v24 }
 0x2e2   :  { %v2775_v23 = vpack.c.bf16 %v2745_v44, %v2744_v5  ;;  %4141 = vtanh.f32 %v2619_v59 }
 0x2e3   :  { %v3838_v8 = vpop.f32.mrb[136].mxu0  ;;  %v2774_v36 = vpack.c.bf16 %v2743_v31, %v2742_v52 }
 0x2e4   :  { %v4743_v48 = vadd.f32 %v3838_v8, %v4680_v40  ;;  %v2391_v55 = vpop.f32.mrb[137].mxu0 }
 0x2e5   :  { %v4746_v25 = vadd.f32 %v4680_v40, %v2391_v55  ;;  %v3839_v9 = vpop.f32.mrb[138].mxu0  ;;  %3876 = vmatprep.mubr.bf16.mxu1 %v2774_v36 }
 0x2e6   :  { %v2496_v42 = vmul.f32 %v4743_v48, %v4743_v48  ;;  %v4751_v45 = vadd.f32 %v3839_v9, %v4680_v40  ;;  %v2394_v17 = vpop.f32.mrb[139].mxu0  ;;  %3877 = vmatmul.mubr.bf16.vlgmr.msra.gmra.mrb[128].mxu1 %v2775_v23 }
 0x2e7   :  { %v2494_v24 = vmul.f32 %v4746_v25, %v4746_v25  ;;  %v4756_v14 = vadd.f32 %v4680_v40, %v2394_v17 }
 0x2e8   :  { %v2528_v20 = vmul.f32 %v2496_v42, %v4743_v48  ;;  %v2497_v37 = vmul.f32 %v4751_v45, %v4751_v45 }
 0x2e9   :  { %v2526_v49 = vmul.f32 %v2494_v24, %v4746_v25  ;;  %v2495_v28 = vmul.f32 %v4756_v14, %v4756_v14  ;;  %v4136_v11 = vpop.eup %4135 }
 0x2ea   :  { %v2560_v13 = vmul.f32 0.044715, %v2528_v20  ;;  %v2529_v18 = vmul.f32 %v2497_v37, %v4751_v45  ;;  %v4138_v61 = vpop.eup %4137  ;;  %v2684_v50 = vadd.f32 1.0, %v4136_v11 }
 0x2eb   :  { %v2558_v38 = vmul.f32 0.044715, %v2526_v49  ;;  %v2527_v21 = vmul.f32 %v2495_v28, %v4756_v14  ;;  %v4140_v53 = vpop.eup %4139  ;;  %v2682_v60 = vadd.f32 1.0, %v4138_v61 }
 0x2ec   :  { %v2592_v30 = vadd.f32 %v2560_v13, %v4743_v48  ;;  %v2561_v43 = vmul.f32 0.044715, %v2529_v18  ;;  %v4142_v57 = vpop.eup %4141  ;;  %v2685_v32 = vadd.f32 1.0, %v4140_v53  ;;  %v2716_v1 = vmul.f32 0.5, %v2684_v50 }
 0x2ed   :  { %v2590_v63 = vadd.f32 %v2558_v38, %v4746_v25  ;;  %v2559_v7 = vmul.f32 0.044715, %v2527_v21  ;;  %v2683_v19 = vadd.f32 1.0, %v4142_v57  ;;  %v2714_v0 = vmul.f32 0.5, %v2682_v60 }
 0x2ee   :  { %v2624_v47 = vmul.f32 0.7978846, %v2592_v30  ;;  %v2593_v3 = vadd.f32 %v2561_v43, %v4751_v45  ;;  %v2717_v54 = vmul.f32 0.5, %v2685_v32  ;;  %v2748_v35 = vmul.f32 %v2716_v1, %v4711_v33 }
 0x2ef   :  { %v2622_v6 = vmul.f32 0.7978846, %v2590_v63  ;;  %v2591_v4 = vadd.f32 %v2559_v7, %v4756_v14  ;;  %v2715_v2 = vmul.f32 0.5, %v2683_v19  ;;  %v2746_v39 = vmul.f32 %v2714_v0, %v4714_v41 }
 0x2f0   :  { %4143 = vtanh.f32 %v2624_v47  ;;  %v2625_v10 = vmul.f32 0.7978846, %v2593_v3  ;;  %v2749_v29 = vmul.f32 %v2717_v54, %v4719_v22 }
 0x2f1   :  { %4145 = vtanh.f32 %v2622_v6  ;;  %v2623_v51 = vmul.f32 0.7978846, %v2591_v4  ;;  %v2747_v34 = vmul.f32 %v2715_v2, %v4724_v26 }
 0x2f2   :  { %4147 = vtanh.f32 %v2625_v10  ;;  %v2777_v27 = vpack.c.bf16 %v2749_v29, %v2748_v35 }
 0x2f3   :  { %4149 = vtanh.f32 %v2623_v51  ;;  %v3842_v12 = vpop.f32.mrb[140].mxu0  ;;  %v2776_v62 = vpack.c.bf16 %v2747_v34, %v2746_v39 }
 0x2f4   :  { %v4775_v15 = vadd.f32 %v3842_v12, %v4680_v40  ;;  %v2407_v58 = vpop.f32.mrb[141].mxu0 }
 0x2f5   :  { %v4778_v46 = vadd.f32 %v4680_v40, %v2407_v58  ;;  %v3843_v56 = vpop.f32.mrb[142].mxu0  ;;  %3880 = vmatprep.mubr.bf16.mxu1 %v2776_v62 }
 0x2f6   :  { %v2500_v33 = vmul.f32 %v4775_v15, %v4775_v15  ;;  %v4783_v22 = vadd.f32 %v3843_v56, %v4680_v40  ;;  %v2410_v41 = vpop.f32.mrb[143].mxu0  ;;  %3881 = vmatmul.mubr.bf16.gmra.mrb[132].mxu1 %v2777_v27 }
 0x2f7   :  { %v2498_v26 = vmul.f32 %v4778_v46, %v4778_v46  ;;  %v4788_v16 = vadd.f32 %v4680_v40, %v2410_v41 }
 0x2f8   :  { %v2532_v5 = vmul.f32 %v2500_v33, %v4775_v15  ;;  %v2501_v44 = vmul.f32 %v4783_v22, %v4783_v22 }
 0x2f9   :  { %v2530_v59 = vmul.f32 %v2498_v26, %v4778_v46  ;;  %v2499_v52 = vmul.f32 %v4788_v16, %v4788_v16 }
 0x2fa   :  { %v4144_v31 = vpop.eup %4143  ;;  %v2564_v23 = vmul.f32 0.044715, %v2532_v5  ;;  %v2533_v8 = vmul.f32 %v2501_v44, %v4783_v22 }
 0x2fb   :  { %v4146_v55 = vpop.eup %4145  ;;  %v2562_v36 = vmul.f32 0.044715, %v2530_v59  ;;  %v2531_v9 = vmul.f32 %v2499_v52, %v4788_v16  ;;  %v2688_v42 = vadd.f32 1.0, %v4144_v31 }
 0x2fc   :  { %v4148_v17 = vpop.eup %4147  ;;  %v2596_v24 = vadd.f32 %v2564_v23, %v4775_v15  ;;  %v2565_v20 = vmul.f32 0.044715, %v2533_v8  ;;  %v2686_v37 = vadd.f32 1.0, %v4146_v55 }
 0x2fd   :  { %v4150_v49 = vpop.eup %4149  ;;  %v2594_v28 = vadd.f32 %v2562_v36, %v4778_v46  ;;  %v2563_v11 = vmul.f32 0.044715, %v2531_v9  ;;  %v2689_v13 = vadd.f32 1.0, %v4148_v17  ;;  %v2720_v18 = vmul.f32 0.5, %v2688_v42 }
 0x2fe   :  { %v2628_v61 = vmul.f32 0.7978846, %v2596_v24  ;;  %v2597_v38 = vadd.f32 %v2565_v20, %v4783_v22  ;;  %v2687_v21 = vadd.f32 1.0, %v4150_v49  ;;  %v2718_v50 = vmul.f32 0.5, %v2686_v37 }
 0x2ff   :  { %v2626_v53 = vmul.f32 0.7978846, %v2594_v28  ;;  %v2595_v30 = vadd.f32 %v2563_v11, %v4788_v16  ;;  %v2721_v43 = vmul.f32 0.5, %v2689_v13  ;;  %v2752_v7 = vmul.f32 %v2720_v18, %v4743_v48 }
 0x300   :  { %4151 = vtanh.f32 %v2628_v61  ;;  %v2629_v60 = vmul.f32 0.7978846, %v2597_v38  ;;  %v2719_v57 = vmul.f32 0.5, %v2687_v21  ;;  %v2750_v1 = vmul.f32 %v2718_v50, %v4746_v25 }
 0x301   :  { %4153 = vtanh.f32 %v2626_v53  ;;  %v2627_v63 = vmul.f32 0.7978846, %v2595_v30  ;;  %v2753_v32 = vmul.f32 %v2721_v43, %v4751_v45 }
 0x302   :  { %4155 = vtanh.f32 %v2629_v60  ;;  %v2751_v47 = vmul.f32 %v2719_v57, %v4756_v14 }
 0x303   :  { %4157 = vtanh.f32 %v2627_v63  ;;  %v3846_v3 = vpop.f32.mrb[144].mxu0  ;;  %v2779_v19 = vpack.c.bf16 %v2753_v32, %v2752_v7 }
 0x304   :  { %v4807_v0 = vadd.f32 %v3846_v3, %v4680_v40  ;;  %v2423_v6 = vpop.f32.mrb[145].mxu0  ;;  %v2778_v4 = vpack.c.bf16 %v2751_v47, %v2750_v1 }
 0x305   :  { %v4810_v54 = vadd.f32 %v4680_v40, %v2423_v6  ;;  %v3847_v10 = vpop.f32.mrb[146].mxu0 }
 0x306   :  { %v2504_v48 = vmul.f32 %v4807_v0, %v4807_v0  ;;  %v4815_v45 = vadd.f32 %v3847_v10, %v4680_v40  ;;  %v2426_v25 = vpop.f32.mrb[147].mxu0  ;;  %3884 = vmatprep.mubr.bf16.mxu1 %v2778_v4 }
 0x307   :  { %v2502_v14 = vmul.f32 %v4810_v54, %v4810_v54  ;;  %v4820_v2 = vadd.f32 %v4680_v40, %v2426_v25  ;;  %3885 = vmatmul.mubr.bf16.gmra.mrb[136].mxu1 %v2779_v19 }
 0x308   :  { %v2536_v51 = vmul.f32 %v2504_v48, %v4807_v0  ;;  %v2505_v35 = vmul.f32 %v4815_v45, %v4815_v45 }
 0x309   :  { %v2534_v29 = vmul.f32 %v2502_v14, %v4810_v54  ;;  %v2503_v39 = vmul.f32 %v4820_v2, %v4820_v2 }
 0x30a   :  { %v4152_v34 = vpop.eup %4151  ;;  %v2568_v12 = vmul.f32 0.044715, %v2536_v51  ;;  %v2537_v27 = vmul.f32 %v2505_v35, %v4815_v45 }
 0x30b   :  { %v4154_v58 = vpop.eup %4153  ;;  %v2566_v62 = vmul.f32 0.044715, %v2534_v29  ;;  %v2535_v56 = vmul.f32 %v2503_v39, %v4820_v2  ;;  %v2692_v33 = vadd.f32 1.0, %v4152_v34 }
 0x30c   :  { %v4156_v41 = vpop.eup %4155  ;;  %v2600_v26 = vadd.f32 %v2568_v12, %v4807_v0  ;;  %v2569_v5 = vmul.f32 0.044715, %v2537_v27  ;;  %v2690_v44 = vadd.f32 1.0, %v4154_v58 }
 0x30d   :  { %v4158_v59 = vpop.eup %4157  ;;  %v2598_v52 = vadd.f32 %v2566_v62, %v4810_v54  ;;  %v2567_v31 = vmul.f32 0.044715, %v2535_v56  ;;  %v2693_v23 = vadd.f32 1.0, %v4156_v41  ;;  %v2724_v8 = vmul.f32 0.5, %v2692_v33 }
 0x30e   :  { %v2632_v55 = vmul.f32 0.7978846, %v2600_v26  ;;  %v2601_v36 = vadd.f32 %v2569_v5, %v4815_v45  ;;  %v2691_v9 = vadd.f32 1.0, %v4158_v59  ;;  %v2722_v42 = vmul.f32 0.5, %v2690_v44 }
 0x30f   :  { %v2630_v17 = vmul.f32 0.7978846, %v2598_v52  ;;  %v2599_v24 = vadd.f32 %v2567_v31, %v4820_v2  ;;  %v2725_v20 = vmul.f32 0.5, %v2693_v23  ;;  %v2756_v11 = vmul.f32 %v2724_v8, %v4775_v15 }
 0x310   :  { %4159 = vtanh.f32 %v2632_v55  ;;  %v2633_v37 = vmul.f32 0.7978846, %v2601_v36  ;;  %v2723_v49 = vmul.f32 0.5, %v2691_v9  ;;  %v2754_v18 = vmul.f32 %v2722_v42, %v4778_v46 }
 0x311   :  { %4161 = vtanh.f32 %v2630_v17  ;;  %v2631_v28 = vmul.f32 0.7978846, %v2599_v24  ;;  %v2757_v13 = vmul.f32 %v2725_v20, %v4783_v22 }
 0x312   :  { %4163 = vtanh.f32 %v2633_v37  ;;  %v2755_v61 = vmul.f32 %v2723_v49, %v4788_v16 }
 0x313   :  { %4165 = vtanh.f32 %v2631_v28  ;;  %v3850_v38 = vpop.f32.mrb[148].mxu0  ;;  %v2781_v21 = vpack.c.bf16 %v2757_v13, %v2756_v11 }
 0x314   :  { %v4839_v50 = vadd.f32 %v3850_v38, %v4680_v40  ;;  %v2439_v53 = vpop.f32.mrb[149].mxu0  ;;  %v2780_v30 = vpack.c.bf16 %v2755_v61, %v2754_v18 }
 0x315   :  { %v4842_v43 = vadd.f32 %v4680_v40, %v2439_v53  ;;  %v3851_v60 = vpop.f32.mrb[150].mxu0 }
 0x316   :  { %v2508_v15 = vmul.f32 %v4839_v50, %v4839_v50  ;;  %v4847_v22 = vadd.f32 %v3851_v60, %v4680_v40  ;;  %v2442_v46 = vpop.f32.mrb[151].mxu0  ;;  %3888 = vmatprep.mubr.bf16.mxu1 %v2780_v30 }
 0x317   :  { %v2506_v16 = vmul.f32 %v4842_v43, %v4842_v43  ;;  %v4852_v57 = vadd.f32 %v4680_v40, %v2442_v46  ;;  %3889 = vmatmul.mubr.bf16.gmra.mrb[140].mxu1 %v2781_v21 }
 0x318   :  { %v2540_v63 = vmul.f32 %v2508_v15, %v4839_v50  ;;  %v2509_v7 = vmul.f32 %v4847_v22, %v4847_v22 }
 0x319   :  { %v2538_v32 = vmul.f32 %v2506_v16, %v4842_v43  ;;  %v2507_v1 = vmul.f32 %v4852_v57, %v4852_v57 }
 0x31a   :  { %v4160_v47 = vpop.eup %4159  ;;  %v2572_v3 = vmul.f32 0.044715, %v2540_v63  ;;  %v2541_v19 = vmul.f32 %v2509_v7, %v4847_v22 }
 0x31b   :  { %v4162_v6 = vpop.eup %4161  ;;  %v2570_v4 = vmul.f32 0.044715, %v2538_v32  ;;  %v2539_v10 = vmul.f32 %v2507_v1, %v4852_v57  ;;  %v2696_v48 = vadd.f32 1.0, %v4160_v47 }
 0x31c   :  { %v4164_v25 = vpop.eup %4163  ;;  %v2604_v14 = vadd.f32 %v2572_v3, %v4839_v50  ;;  %v2573_v51 = vmul.f32 0.044715, %v2541_v19  ;;  %v2694_v35 = vadd.f32 1.0, %v4162_v6 }
 0x31d   :  { %v4166_v29 = vpop.eup %4165  ;;  %v2602_v39 = vadd.f32 %v2570_v4, %v4842_v43  ;;  %v2571_v34 = vmul.f32 0.044715, %v2539_v10  ;;  %v2697_v12 = vadd.f32 1.0, %v4164_v25  ;;  %v2728_v27 = vmul.f32 0.5, %v2696_v48 }
 0x31e   :  { %v2636_v58 = vmul.f32 0.7978846, %v2604_v14  ;;  %v2605_v62 = vadd.f32 %v2573_v51, %v4847_v22  ;;  %v2695_v56 = vadd.f32 1.0, %v4166_v29  ;;  %v2726_v33 = vmul.f32 0.5, %v2694_v35 }
 0x31f   :  { %v2634_v41 = vmul.f32 0.7978846, %v2602_v39  ;;  %v2603_v26 = vadd.f32 %v2571_v34, %v4852_v57  ;;  %v2729_v5 = vmul.f32 0.5, %v2697_v12  ;;  %v2760_v31 = vmul.f32 %v2728_v27, %v4807_v0 }
 0x320   :  { %4167 = vtanh.f32 %v2636_v58  ;;  %v2637_v44 = vmul.f32 0.7978846, %v2605_v62  ;;  %v2727_v59 = vmul.f32 0.5, %v2695_v56  ;;  %v2758_v8 = vmul.f32 %v2726_v33, %v4810_v54 }
 0x321   :  { %4169 = vtanh.f32 %v2634_v41  ;;  %v2635_v52 = vmul.f32 0.7978846, %v2603_v26  ;;  %v2761_v23 = vmul.f32 %v2729_v5, %v4815_v45 }
 0x322   :  { %4171 = vtanh.f32 %v2637_v44  ;;  %v2759_v55 = vmul.f32 %v2727_v59, %v4820_v2 }
 0x323   :  { %4173 = vtanh.f32 %v2635_v52  ;;  %v3854_v36 = vpop.f32.mrb[152].mxu0  ;;  %v2783_v9 = vpack.c.bf16 %v2761_v23, %v2760_v31 }
 0x324   :  { %v4871_v42 = vadd.f32 %v3854_v36, %v4680_v40  ;;  %v2455_v17 = vpop.f32.mrb[153].mxu0  ;;  %v2782_v24 = vpack.c.bf16 %v2759_v55, %v2758_v8 }
 0x325   :  { %v4874_v20 = vadd.f32 %v4680_v40, %v2455_v17  ;;  %v3855_v37 = vpop.f32.mrb[154].mxu0 }
 0x326   :  { %v2512_v0 = vmul.f32 %v4871_v42, %v4871_v42  ;;  %v4879_v45 = vadd.f32 %v3855_v37, %v4680_v40  ;;  %v2458_v54 = vpop.f32.mrb[155].mxu0  ;;  %3892 = vmatprep.mubr.bf16.mxu1 %v2782_v24 }
 0x327   :  { %v2510_v2 = vmul.f32 %v4874_v20, %v4874_v20  ;;  %v4884_v49 = vadd.f32 %v4680_v40, %v2458_v54  ;;  %3893 = vmatmul.mubr.bf16.gmra.mrb[144].mxu1 %v2783_v9 }
 0x328   :  { %v2544_v28 = vmul.f32 %v2512_v0, %v4871_v42  ;;  %v2513_v11 = vmul.f32 %v4879_v45, %v4879_v45 }
 0x329   :  { %v2542_v13 = vmul.f32 %v2510_v2, %v4874_v20  ;;  %v2511_v18 = vmul.f32 %v4884_v49, %v4884_v49 }
 0x32a   :  { %v4168_v61 = vpop.eup %4167  ;;  %v2576_v38 = vmul.f32 0.044715, %v2544_v28  ;;  %v2545_v21 = vmul.f32 %v2513_v11, %v4879_v45 }
 0x32b   :  { %v4170_v53 = vpop.eup %4169  ;;  %v2574_v30 = vmul.f32 0.044715, %v2542_v13  ;;  %v2543_v60 = vmul.f32 %v2511_v18, %v4884_v49  ;;  %v2700_v15 = vadd.f32 1.0, %v4168_v61 }
 0x32c   :  { %v4172_v46 = vpop.eup %4171  ;;  %v2608_v16 = vadd.f32 %v2576_v38, %v4871_v42  ;;  %v2577_v63 = vmul.f32 0.044715, %v2545_v21  ;;  %v2698_v7 = vadd.f32 1.0, %v4170_v53 }
 0x32d   :  { %v4174_v32 = vpop.eup %4173  ;;  %v2606_v1 = vadd.f32 %v2574_v30, %v4874_v20  ;;  %v2575_v47 = vmul.f32 0.044715, %v2543_v60  ;;  %v2701_v3 = vadd.f32 1.0, %v4172_v46  ;;  %v2732_v19 = vmul.f32 0.5, %v2700_v15 }
 0x32e   :  { %v2640_v6 = vmul.f32 0.7978846, %v2608_v16  ;;  %v2609_v4 = vadd.f32 %v2577_v63, %v4879_v45  ;;  %v2699_v10 = vadd.f32 1.0, %v4174_v32  ;;  %v2730_v48 = vmul.f32 0.5, %v2698_v7 }
 0x32f   :  { %v2638_v25 = vmul.f32 0.7978846, %v2606_v1  ;;  %v2607_v14 = vadd.f32 %v2575_v47, %v4884_v49  ;;  %v2733_v51 = vmul.f32 0.5, %v2701_v3  ;;  %v2764_v34 = vmul.f32 %v2732_v19, %v4839_v50 }
 0x330   :  { %4175 = vtanh.f32 %v2640_v6  ;;  %v2641_v35 = vmul.f32 0.7978846, %v2609_v4  ;;  %v2731_v29 = vmul.f32 0.5, %v2699_v10  ;;  %v2762_v27 = vmul.f32 %v2730_v48, %v4842_v43 }
 0x331   :  { %4177 = vtanh.f32 %v2638_v25  ;;  %v2639_v39 = vmul.f32 0.7978846, %v2607_v14  ;;  %v2765_v12 = vmul.f32 %v2733_v51, %v4847_v22 }
 0x332   :  { %4179 = vtanh.f32 %v2641_v35  ;;  %v2763_v58 = vmul.f32 %v2731_v29, %v4852_v57 }
 0x333   :  { %4181 = vtanh.f32 %v2639_v39  ;;  %v3858_v62 = vpop.f32.mrb[156].mxu0  ;;  %v2785_v56 = vpack.c.bf16 %v2765_v12, %v2764_v34 }
 0x334   :  { %v4903_v33 = vadd.f32 %v3858_v62, %v4680_v40  ;;  %v2471_v41 = vpop.f32.mrb[157].mxu0  ;;  %v2784_v26 = vpack.c.bf16 %v2763_v58, %v2762_v27 }
 0x335   :  { %v4906_v5 = vadd.f32 %v4680_v40, %v2471_v41  ;;  %v3859_v44 = vpop.f32.mrb[158].mxu0  ;;  %v4927_v41 = vld [vmem:[%s4979_s6] ss:$0 sm:$0xff]  ;;  %s4317_s6 = smov [#allocation10]  }
 0x336   :  { %v2516_v50 = vmul.f32 %v4903_v33, %v4903_v33  ;;  %v2483_v22 = vadd.f32 %v3859_v44, %v4680_v40  ;;  %v2474_v43 = vpop.f32.mrb[159].mxu0  ;;  %3896 = vmatprep.mubr.bf16.mxu1 %v2784_v26  ;;  %s3059_s29 = sshll.u32 %s4317_s6, 4  ;;  %s3060_s29 = int_to_ptr.vmem [resolvable:$true] %s3059_s29 }
 0x337   :  { %v2514_v57 = vmul.f32 %v4906_v5, %v4906_v5  ;;  %v2475_v59 = vadd.f32 %v4680_v40, %v2474_v43  ;;  %3897 = vmatmul.mubr.bf16.gmra.mrb[148].mxu1 %v2785_v56  ;;  %s4279_s30 = scalar_lea.vmem %s3060_s29, 4096  ;;  %p4284_p5 = scmp.lt.s32.totalorder %s3060_s29, %s3060_s29 }
 0x338   :  { %v2548_v52 = vmul.f32 %v2516_v50, %v4903_v33  ;;  %v2517_v31 = vmul.f32 %v2483_v22, %v2483_v22  ;;  %p4280_p4 = scmp.ne.s32.totalorder %s3060_s29, %s4279_s30  ;;  %p4285_p6 = scmp.lt.s32.totalorder %s4279_s30, %s4279_s30 }
 0x339   :  { %v2546_v23 = vmul.f32 %v2514_v57, %v4906_v5  ;;  %v2515_v8 = vmul.f32 %v2475_v59, %v2475_v59 }
 0x33a   :  { %v4176_v55 = vpop.eup %4175  ;;  %v2580_v36 = vmul.f32 0.044715, %v2548_v52  ;;  %v2549_v9 = vmul.f32 %v2517_v31, %v2483_v22  ;;  %p4286_p7 = por %p4285_p6, %p4284_p5 }
 0x33b   :  { %v4178_v17 = vpop.eup %4177  ;;  %v2578_v24 = vmul.f32 0.044715, %v2546_v23  ;;  %v2547_v37 = vmul.f32 %v2515_v8, %v2475_v59  ;;  %v2704_v0 = vadd.f32 1.0, %v4176_v55 }
 0x33c   :  { %v4180_v54 = vpop.eup %4179  ;;  %v2612_v2 = vadd.f32 %v2580_v36, %v4903_v33  ;;  %v2581_v28 = vmul.f32 0.044715, %v2549_v9  ;;  %v2702_v11 = vadd.f32 1.0, %v4178_v17  ;;  %p4287_p8 = pnand %p4286_p7, %p4280_p4 }
 0x33d   :  { %v4182_v40 = vpop.eup %4181  ;;  %v2610_v13 = vadd.f32 %v2578_v24, %v4906_v5  ;;  %v2579_v18 = vmul.f32 0.044715, %v2547_v37  ;;  %v2705_v61 = vadd.f32 1.0, %v4180_v54  ;;  %v2736_v38 = vmul.f32 0.5, %v2704_v0 }
 0x33e   :  { %v2644_v21 = vmul.f32 0.7978846, %v2612_v2  ;;  %v2613_v53 = vadd.f32 %v2581_v28, %v2483_v22  ;;  %v2703_v30 = vadd.f32 1.0, %v4182_v40  ;;  %v2734_v60 = vmul.f32 0.5, %v2702_v11 }
 0x33f   :  { %v2642_v15 = vmul.f32 0.7978846, %v2610_v13  ;;  %v2611_v46 = vadd.f32 %v2579_v18, %v2475_v59  ;;  %v2737_v16 = vmul.f32 0.5, %v2705_v61  ;;  %v2768_v1 = vmul.f32 %v2736_v38, %v4871_v42 }
 0x340   :  { %4183 = vtanh.f32 %v2644_v21  ;;  %v2645_v63 = vmul.f32 0.7978846, %v2613_v53  ;;  %v2735_v7 = vmul.f32 0.5, %v2703_v30  ;;  %v2766_v3 = vmul.f32 %v2734_v60, %v4874_v20 }
 0x341   :  { %4185 = vtanh.f32 %v2642_v15  ;;  %v2643_v32 = vmul.f32 0.7978846, %v2611_v46  ;;  %v2769_v47 = vmul.f32 %v2737_v16, %v4879_v45 }
 0x342   :  { %4187 = vtanh.f32 %v2645_v63  ;;  %v2767_v19 = vmul.f32 %v2735_v7, %v4884_v49 }
 0x343   :  { %4189 = vtanh.f32 %v2643_v32  ;;  %v2787_v6 = vpack.c.bf16 %v2769_v47, %v2768_v1 }
 0x344   :  { %v2786_v4 = vpack.c.bf16 %v2767_v19, %v2766_v3 }
 0x346   :  { %3900 = vmatprep.mubr.bf16.mxu1 %v2786_v4 }
 0x347   :  { %3901 = vmatmul.mubr.bf16.gmra.mrb[152].mxu1 %v2787_v6 }
 0x34a   :  { %v4184_v10 = vpop.eup %4183 }
 0x34b   :  { %v4186_v48 = vpop.eup %4185  ;;  %v2708_v25 = vadd.f32 1.0, %v4184_v10 }
 0x34c   :  { %v4188_v14 = vpop.eup %4187  ;;  %v2706_v51 = vadd.f32 1.0, %v4186_v48 }
 0x34d   :  { %v4190_v35 = vpop.eup %4189  ;;  %v2709_v29 = vadd.f32 1.0, %v4188_v14  ;;  %v2740_v42 = vmul.f32 0.5, %v2708_v25 }
 0x34e   :  { %v2707_v39 = vadd.f32 1.0, %v4190_v35  ;;  %v2738_v45 = vmul.f32 0.5, %v2706_v51 }
 0x34f   :  { %v2741_v34 = vmul.f32 0.5, %v2709_v29  ;;  %v2772_v20 = vmul.f32 %v2740_v42, %v4903_v33 }
 0x350   :  { %v2739_v12 = vmul.f32 0.5, %v2707_v39  ;;  %v2770_v27 = vmul.f32 %v2738_v45, %v4906_v5 }
 0x351   :  { %v2773_v49 = vmul.f32 %v2741_v34, %v2483_v22 }
 0x352   :  { %v2771_v58 = vmul.f32 %v2739_v12, %v2475_v59 }
 0x353   :  { %v2789_v62 = vpack.c.bf16 %v2773_v49, %v2772_v20 }
 0x354   :  { %v2788_v56 = vpack.c.bf16 %v2771_v58, %v2770_v27 }
 0x356   :  { %3904 = vmatprep.mubr.bf16.mxu1 %v2788_v56 }
 0x357   :  { %3905 = vmatmul.mubr.bf16.gmra.mrb[156].mxu1 %v2789_v62 }
 0x3b9   :  { %v3878_v26 = vpop.f32.mrb[128].mxu1 }
 0x3ba   :  { %v2904_v44 = vadd.f32 %v3878_v26, %v4927_v41  ;;  %v2895_v50 = vpop.f32.mrb[129].mxu1 }
 0x3bb   :  { %v2896_v43 = vadd.f32 %v4927_v41, %v2895_v50  ;;  %v3879_v33 = vpop.f32.mrb[130].mxu1 }
 0x3bc   :  { %3024 = vst [vmem:[#allocation10 + $0x10] sm:$0xff] %v2904_v44  ;;  %v2907_v5 = vadd.f32 %v3879_v33, %v4927_v41  ;;  %v2898_v22 = vpop.f32.mrb[131].mxu1 }
 0x3bd   :  { %3022 = vst [vmem:[#allocation10] sm:$0xff] %v2896_v43  ;;  %v2899_v57 = vadd.f32 %v4927_v41, %v2898_v22 }
 0x3be   :  { %3025 = vst [vmem:[#allocation10 + $0x18] sm:$0xff] %v2907_v5 }
 0x3bf   :  { %3023 = vst [vmem:[#allocation10 + $0x8] sm:$0xff] %v2899_v57 }
 0x3c9   :  { %v3882_v59 = vpop.f32.mrb[132].mxu1 }
 0x3ca   :  { %v2920_v52 = vadd.f32 %v3882_v59, %v4927_v41  ;;  %v2911_v31 = vpop.f32.mrb[133].mxu1 }
 0x3cb   :  { %v2912_v23 = vadd.f32 %v4927_v41, %v2911_v31  ;;  %v3883_v8 = vpop.f32.mrb[134].mxu1 }
 0x3cc   :  { %3028 = vst [vmem:[#allocation10 + $0x30] sm:$0xff] %v2920_v52  ;;  %v2923_v55 = vadd.f32 %v3883_v8, %v4927_v41  ;;  %v2914_v36 = vpop.f32.mrb[135].mxu1 }
 0x3cd   :  { %3026 = vst [vmem:[#allocation10 + $0x20] sm:$0xff] %v2912_v23  ;;  %v2915_v9 = vadd.f32 %v4927_v41, %v2914_v36 }
 0x3ce   :  { %3029 = vst [vmem:[#allocation10 + $0x38] sm:$0xff] %v2923_v55 }
 0x3cf   :  { %3027 = vst [vmem:[#allocation10 + $0x28] sm:$0xff] %v2915_v9 }
 0x3da   :  { %v3886_v17 = vpop.f32.mrb[136].mxu1 }
 0x3db   :  { %v2936_v24 = vadd.f32 %v3886_v17, %v4927_v41  ;;  %v2927_v37 = vpop.f32.mrb[137].mxu1 }
 0x3dc   :  { %v2928_v0 = vadd.f32 %v4927_v41, %v2927_v37  ;;  %v3887_v54 = vpop.f32.mrb[138].mxu1 }
 0x3dd   :  { %3032 = vst [vmem:[#allocation10 + $0x50] sm:$0xff] %v2936_v24  ;;  %v2939_v2 = vadd.f32 %v3887_v54, %v4927_v41  ;;  %v2930_v28 = vpop.f32.mrb[139].mxu1 }
 0x3de   :  { %3030 = vst [vmem:[#allocation10 + $0x40] sm:$0xff] %v2928_v0  ;;  %v2931_v11 = vadd.f32 %v4927_v41, %v2930_v28 }
 0x3df   :  { %3033 = vst [vmem:[#allocation10 + $0x58] sm:$0xff] %v2939_v2 }
 0x3e0   :  { %3031 = vst [vmem:[#allocation10 + $0x48] sm:$0xff] %v2931_v11 }
 0x3ea   :  { %v3890_v40 = vpop.f32.mrb[140].mxu1 }
 0x3eb   :  { %v2952_v13 = vadd.f32 %v3890_v40, %v4927_v41  ;;  %v2943_v18 = vpop.f32.mrb[141].mxu1 }
 0x3ec   :  { %v2944_v61 = vadd.f32 %v4927_v41, %v2943_v18  ;;  %v3891_v38 = vpop.f32.mrb[142].mxu1 }
 0x3ed   :  { %3036 = vst [vmem:[#allocation10 + $0x70] sm:$0xff] %v2952_v13  ;;  %v2955_v21 = vadd.f32 %v3891_v38, %v4927_v41  ;;  %v2946_v53 = vpop.f32.mrb[143].mxu1 }
 0x3ee   :  { %3034 = vst [vmem:[#allocation10 + $0x60] sm:$0xff] %v2944_v61  ;;  %v2947_v30 = vadd.f32 %v4927_v41, %v2946_v53 }
 0x3ef   :  { %3037 = vst [vmem:[#allocation10 + $0x78] sm:$0xff] %v2955_v21 }
 0x3f0   :  { %3035 = vst [vmem:[#allocation10 + $0x68] sm:$0xff] %v2947_v30 }
 0x3fa   :  { %v3894_v60 = vpop.f32.mrb[144].mxu1 }
 0x3fb   :  { %v2968_v15 = vadd.f32 %v3894_v60, %v4927_v41  ;;  %v2959_v46 = vpop.f32.mrb[145].mxu1 }
 0x3fc   :  { %v2960_v16 = vadd.f32 %v4927_v41, %v2959_v46  ;;  %v3895_v63 = vpop.f32.mrb[146].mxu1 }
 0x3fd   :  { %3040 = vst [vmem:[#allocation10 + $0x90] sm:$0xff] %v2968_v15  ;;  %v2971_v7 = vadd.f32 %v3895_v63, %v4927_v41  ;;  %v2962_v32 = vpop.f32.mrb[147].mxu1 }
 0x3fe   :  { %3038 = vst [vmem:[#allocation10 + $0x80] sm:$0xff] %v2960_v16  ;;  %v2963_v1 = vadd.f32 %v4927_v41, %v2962_v32 }
 0x3ff   :  { %3041 = vst [vmem:[#allocation10 + $0x98] sm:$0xff] %v2971_v7 }
 0x400   :  { %3039 = vst [vmem:[#allocation10 + $0x88] sm:$0xff] %v2963_v1 }
 0x40a   :  { %v3898_v47 = vpop.f32.mrb[148].mxu1 }
 0x40b   :  { %v2984_v3 = vadd.f32 %v3898_v47, %v4927_v41  ;;  %v2975_v19 = vpop.f32.mrb[149].mxu1 }
 0x40c   :  { %v2976_v6 = vadd.f32 %v4927_v41, %v2975_v19  ;;  %v3899_v4 = vpop.f32.mrb[150].mxu1 }
 0x40d   :  { %3044 = vst [vmem:[#allocation10 + $0xb0] sm:$0xff] %v2984_v3  ;;  %v2987_v10 = vadd.f32 %v3899_v4, %v4927_v41  ;;  %v2978_v48 = vpop.f32.mrb[151].mxu1 }
 0x40e   :  { %3042 = vst [vmem:[#allocation10 + $0xa0] sm:$0xff] %v2976_v6  ;;  %v2979_v25 = vadd.f32 %v4927_v41, %v2978_v48 }
 0x40f   :  { %3045 = vst [vmem:[#allocation10 + $0xb8] sm:$0xff] %v2987_v10 }
 0x410   :  { %3043 = vst [vmem:[#allocation10 + $0xa8] sm:$0xff] %v2979_v25 }
 0x41a   :  { %v3902_v14 = vpop.f32.mrb[152].mxu1 }
 0x41b   :  { %v3000_v51 = vadd.f32 %v3902_v14, %v4927_v41  ;;  %v2991_v35 = vpop.f32.mrb[153].mxu1 }
 0x41c   :  { %v2992_v29 = vadd.f32 %v4927_v41, %v2991_v35  ;;  %v3903_v42 = vpop.f32.mrb[154].mxu1 }
 0x41d   :  { %3048 = vst [vmem:[#allocation10 + $0xd0] sm:$0xff] %v3000_v51  ;;  %v3003_v39 = vadd.f32 %v3903_v42, %v4927_v41  ;;  %v2994_v45 = vpop.f32.mrb[155].mxu1 }
 0x41e   :  { %3046 = vst [vmem:[#allocation10 + $0xc0] sm:$0xff] %v2992_v29  ;;  %v2995_v34 = vadd.f32 %v4927_v41, %v2994_v45 }
 0x41f   :  { %3049 = vst [vmem:[#allocation10 + $0xd8] sm:$0xff] %v3003_v39 }
 0x420   :  { %3047 = vst [vmem:[#allocation10 + $0xc8] sm:$0xff] %v2995_v34 }
 0x42a   :  { %v3906_v12 = vpop.f32.mrb[156].mxu1 }
 0x42b   :  { %v3016_v20 = vadd.f32 %v3906_v12, %v4927_v41  ;;  %v3007_v49 = vpop.f32.mrb[157].mxu1 }
 0x42c   :  { %v3008_v27 = vadd.f32 %v4927_v41, %v3007_v49  ;;  %v3907_v58 = vpop.f32.mrb[158].mxu1 }
 0x42d   :  { %3052 = vst [vmem:[#allocation10 + $0xf0] sm:$0xff] %v3016_v20  ;;  %v3019_v62 = vadd.f32 %v3907_v58, %v4927_v41  ;;  %v3010_v56 = vpop.f32.mrb[159].mxu1 }
 0x42e   :  { %3050 = vst [vmem:[#allocation10 + $0xe0] sm:$0xff] %v3008_v27  ;;  %v3011_v26 = vadd.f32 %v4927_v41, %v3010_v56 }
 0x42f   :  { %3053 = vst [vmem:[#allocation10 + $0xf8] sm:$0xff] %v3019_v62 }
 0x430   :  { %3051 = vst [vmem:[#allocation10 + $0xe8] sm:$0xff] %v3011_v26 }
 0x431   :  { %4290 = shalt.err (!%p4287_p8)
}
 0x432   :  { %s4291_s10 = scalar_lea.hbm %s4980_s7, 4096 }
 0x433   :  { %p4292_p9 = scmp.ne.s32.totalorder %s4980_s7, %s4291_s10  ;;  %p4295_p10 = scmp.lt.u32.totalorder %s4291_s10, %s4980_s7 }
 0x435   :  { %p4297_p11 = pnand %p4295_p10, %p4292_p9 }
 0x437   :  { %4300 = shalt.err (!%p4297_p11)
}
 0x438   :  { %s4318_s18 = smov 128   ;;  %s4319_s0 = smov 8  }
 0x439   :  { %3065 = dma.vmem_to_hbm [thread:$0]  %s3060_s29, 4096, %s4980_s7, [#allocation4], %s4318_s18, %s4318_s18, %s4319_s0  }
 0x43a   :  { %4307 = dma.done.wait [#allocation4], 4096  }
 0x43b   :  { %4308 = vsyncadd [#allocation4], 4294963200 }
 0x43c   :  { %3069 = vsyncpa [#allocation3], 1 }
 0x43d   :  { %3070 = vsyncpa [#allocation6], 1 }
 0x43e   :  { %3071 = vsyncpa [#allocation9], 1 }
 0x43f   :  { %3072 = vsyncpa [#allocation4], 1 }

</bundles_post_ra>
